<compile_context>
chip_gen: v6e
topology: v6e:2x2x1
jax: 0.10.0
libtpu: 0.0.40
codegen_flags: <defaults>
</compile_context>

<pallas_src>
import jax
import jax.numpy as jnp
from jax.experimental import pallas as pl
from jax.experimental.pallas import tpu as pltpu


# Padded feature sizes (lane / sublane alignment).
C1_PAD, C2_PAD = 128, 128          # conv out channels: 10 -> 128, 20 -> 128
K1_PAD, K2_PAD = 32, 256           # conv im2col K:    25 -> 32, 250 -> 256
F1_PAD, F2_PAD, F3_PAD = 256, 256, 128   # fc outs: 220 -> 256, 150 -> 256, 10 -> 128


def _round_up(x, m):
    return ((x + m - 1) // m) * m


# ---------------------------------------------------------------------------
# Pallas kernels
# ---------------------------------------------------------------------------
def _conv_relu_pool_kernel(x0_ref, x1_ref, x2_ref, x3_ref, w_ref, b_ref, o_ref):
    """Fused conv (as im2col matmul) + bias + ReLU + 2x2 max-pool.

    x{0..3}_ref: (TILE_M, K) im2col slabs, one per pool-window corner.
    out = max_c relu(x_c @ w + b)   (== maxpool(relu(conv)) since relu is monotone)
    """
    w = w_ref[...]
    b = b_ref[...]

    def branch(x_ref):
        y = jnp.dot(x_ref[...], w, preferred_element_type=jnp.float32) + b
        return jnp.maximum(y, 0.0)

    y01 = jnp.maximum(branch(x0_ref), branch(x1_ref))
    y23 = jnp.maximum(branch(x2_ref), branch(x3_ref))
    o_ref[...] = jnp.maximum(y01, y23).astype(o_ref.dtype)


def conv_relu_pool(corners, w, b, *, tile_m=512):
    """corners: 4 slabs [M, Kpad] (pool corners); w: [Kpad, Npad]; b: [Npad].

    Returns the pooled activation as a lane-dense [M, Npad] slab.
    Row axis is tiled (double-buffered pipeline, parallel across TCs on v7x).
    """
    M, K = corners[0].shape
    Npad = w.shape[1]
    tile_m = min(tile_m, _round_up(M, 8))
    Mp = _round_up(M, tile_m)
    if Mp != M:
        corners = [jnp.pad(c, ((0, Mp - M), (0, 0))) for c in corners]
    b2 = b.reshape(1, Npad)

    x_spec = pl.BlockSpec((tile_m, K), lambda i: (i, 0))
    out = pl.pallas_call(
        _conv_relu_pool_kernel,
        out_shape=jax.ShapeDtypeStruct((Mp, Npad), jnp.float32),
        grid=(Mp // tile_m,),
        in_specs=[x_spec, x_spec, x_spec, x_spec,
                  pl.BlockSpec((K, Npad), lambda i: (0, 0)),     # weights: resident
                  pl.BlockSpec((1, Npad), lambda i: (0, 0))],    # bias:    resident
        out_specs=pl.BlockSpec((tile_m, Npad), lambda i: (i, 0)),
        compiler_params=pltpu.CompilerParams(
            dimension_semantics=("parallel",)),
    )(*corners, w, b2)
    return out[:M]


def _fc_chain_kernel(x_ref, w1_ref, b1_ref, w2_ref, b2_ref, w3_ref, b3_ref, o_ref):
    """fc1 -> relu -> (dropout=id) -> fc2 -> relu -> (dropout=id) -> fc3 -> relu."""
    h = jnp.dot(x_ref[...], w1_ref[...], preferred_element_type=jnp.float32) + b1_ref[...]
    h = jnp.maximum(h, 0.0)
    h = jnp.dot(h, w2_ref[...], preferred_element_type=jnp.float32) + b2_ref[...]
    h = jnp.maximum(h, 0.0)
    h = jnp.dot(h, w3_ref[...], preferred_element_type=jnp.float32) + b3_ref[...]
    o_ref[...] = jnp.maximum(h, 0.0).astype(o_ref.dtype)


def fc_chain(x, w1, b1, w2, b2, w3, b3, *, tile_m=256):
    """x: [B, 320]; all weights/biases pre-padded to 128/256-aligned widths."""
    B, K1 = x.shape
    N1, N2, N3 = w1.shape[1], w2.shape[1], w3.shape[1]
    tile_m = min(tile_m, _round_up(B, 8))
    Bp = _round_up(B, tile_m)
    if Bp != B:
        x = jnp.pad(x, ((0, Bp - B), (0, 0)))

    out = pl.pallas_call(
        _fc_chain_kernel,
        out_shape=jax.ShapeDtypeStruct((Bp, N3), jnp.float32),
        grid=(Bp // tile_m,),
        in_specs=[
            pl.BlockSpec((tile_m, K1), lambda i: (i, 0)),
            pl.BlockSpec((K1, N1), lambda i: (0, 0)),
            pl.BlockSpec((1, N1), lambda i: (0, 0)),
            pl.BlockSpec((N1, N2), lambda i: (0, 0)),
            pl.BlockSpec((1, N2), lambda i: (0, 0)),
            pl.BlockSpec((N2, N3), lambda i: (0, 0)),
            pl.BlockSpec((1, N3), lambda i: (0, 0)),
        ],
        out_specs=pl.BlockSpec((tile_m, N3), lambda i: (i, 0)),
        compiler_params=pltpu.CompilerParams(
            dimension_semantics=("parallel",)),
    )(x, w1, b1.reshape(1, N1), w2, b2.reshape(1, N2), w3, b3.reshape(1, N3))
    return out[:B]


# ---------------------------------------------------------------------------
# XLA glue: im2col slabs split by 2x2 pool-window corner
# ---------------------------------------------------------------------------
def _im2col_pool_corner(x_nhwc, k, ph, pw):
    """Patch rows [B*Hp*Wp, C*k*k] for conv-output positions (2i+ph, 2j+pw),
    flattened in (c, kh, kw) order (matches PyTorch weight.reshape(out,-1))."""
    B, H, W, C = x_nhwc.shape
    Ho, Wo = H - k + 1, W - k + 1
    Hp, Wp = Ho // 2, Wo // 2
    cols = []
    for kh in range(k):
        for kw in range(k):
            sl = x_nhwc[:, ph + kh: ph + kh + 2 * Hp: 2,
                           pw + kw: pw + kw + 2 * Wp: 2, :]      # [B, Hp, Wp, C]
            cols.append(sl)
    p = jnp.stack(cols, axis=3)                                   # [B, Hp, Wp, k*k, C]
    p = jnp.transpose(p, (0, 1, 2, 4, 3))                         # [B, Hp, Wp, C, k*k]
    return p.reshape(B * Hp * Wp, C * k * k)


def im2col_pool_corners(x_nhwc, k, k_pad):
    slabs = []
    for ph in (0, 1):
        for pw in (0, 1):
            s = _im2col_pool_corner(x_nhwc, k, ph, pw)
            kk = s.shape[1]
            if k_pad != kk:
                s = jnp.pad(s, ((0, 0), (0, k_pad - kk)))         # zero-pad K
            slabs.append(s)
    return slabs


# ---------------------------------------------------------------------------
# Parameters (deterministic synthetic init; logical shapes from NN_CNN.__init__,
# zero-padded to lane/sublane-aligned widths)
# ---------------------------------------------------------------------------
def init_params(key):
    ks = jax.random.split(key, 10)
    s = 0.05

    def w_pad(kk, logical, padded):
        w = jax.random.normal(kk, logical, jnp.float32) * s
        return jnp.pad(w, [(0, p - l) for l, p in zip(logical, padded)])

    def b_pad(kk, logical, padded):
        b = jax.random.normal(kk, (logical,), jnp.float32) * s
        return jnp.pad(b, (0, padded - logical))

    return {
        # conv1: 1 -> 10, k=5. im2col weight [25, 10] -> padded [32, 128].
        "w1":  w_pad(ks[0], (25, 10), (K1_PAD, C1_PAD)),
        "b1":  b_pad(ks[1], 10, C1_PAD),
        # conv2: 10 -> 20, k=5. [250, 20] -> [256, 128].
        "w2":  w_pad(ks[2], (250, 20), (K2_PAD, C2_PAD)),
        "b2":  b_pad(ks[3], 20, C2_PAD),
        # fc1: 320 -> 220. [320, 220] -> [320, 256].
        # NOTE: rows indexed in NHWC (h, w, c) flatten order of the pooled conv2
        # activation; to load real PyTorch weights permute fc1.weight once from
        # (c, h, w) to (h, w, c) — mathematically identical, removes a transpose.
        "wf1": w_pad(ks[4], (320, 220), (320, F1_PAD)),
        "bf1": b_pad(ks[5], 220, F1_PAD),
        # fc2: 220 -> 150. [220, 150] -> [256, 256].
        "wf2": w_pad(ks[6], (220, 150), (F1_PAD, F2_PAD)),
        "bf2": b_pad(ks[7], 150, F2_PAD),
        # fc3: 150 -> 10. [150, 10] -> [256, 128].
        "wf3": w_pad(ks[8], (150, 10), (F2_PAD, F3_PAD)),
        "bf3": b_pad(ks[9], 10, F3_PAD),
    }


# ---------------------------------------------------------------------------
# Forward pass (matches NN_CNN.forward, eval-mode dropout)
# ---------------------------------------------------------------------------
def nn_cnn_forward(x_nchw, params):
    B = x_nchw.shape[0]
    x = jnp.transpose(x_nchw, (0, 2, 3, 1))                      # NCHW -> NHWC [B,28,28,1]

    # conv1 + relu + 2x2 maxpool  (one fused Pallas call)
    corners = im2col_pool_corners(x, 5, K1_PAD)                  # 4 x [B*144, 32]
    h = conv_relu_pool(corners, params["w1"], params["b1"])      # [B*144, 128]
    h = h.reshape(B, 12, 12, C1_PAD)[:, :, :, :10]               # drop zero pad channels

    # conv2 + relu + 2x2 maxpool  (one fused Pallas call)
    corners = im2col_pool_corners(h, 5, K2_PAD)                  # 4 x [B*16, 256]
    h = conv_relu_pool(corners, params["w2"], params["b2"])      # [B*16, 128]
    h = h.reshape(B, 4, 4, C2_PAD)[:, :, :, :20]                 # [B,4,4,20]

    # flatten in NHWC (h, w, c) order; wf1 rows stored in matching order, so no
    # NCHW transpose is needed here.
    h = h.reshape(B, 320)

    # fc1 -> relu -> (drop=id) -> fc2 -> relu -> (drop=id) -> fc3 -> relu (fused)
    out = fc_chain(h, params["wf1"], params["bf1"],
                   params["wf2"], params["bf2"],
                   params["wf3"], params["bf3"])                 # [B, 128]
    return out[:, :10]


if __name__ == "__main__":
    key = jax.random.PRNGKey(0)
    k_x, k_p = jax.random.split(key)

    params = init_params(k_p)
    x = jax.random.normal(k_x, (2, 1, 28, 28), jnp.float32)      # NCHW, MNIST-sized

    fwd = jax.jit(lambda xx: nn_cnn_forward(xx, params))
    out = fwd(x)
    out = jax.block_until_ready(out)

    assert out.shape == (2, 10), out.shape
    assert bool(jnp.all(jnp.isfinite(out)))
    assert bool(jnp.all(out >= 0.0))                             # final F.relu
    print("KERNEL_OK")
</pallas_src>

<mosaic_0001>
module attributes {stable_mosaic.version = 11 : i64} {
  func.func @_conv_relu_pool_kernel(%arg0: i32, %arg1: memref<288x32xf32, #tpu.memory_space<vmem>>, %arg2: memref<288x32xf32, #tpu.memory_space<vmem>>, %arg3: memref<288x32xf32, #tpu.memory_space<vmem>>, %arg4: memref<288x32xf32, #tpu.memory_space<vmem>>, %arg5: memref<32x128xf32, #tpu.memory_space<vmem>>, %arg6: memref<1x128xf32, #tpu.memory_space<vmem>>, %arg7: memref<288x128xf32, #tpu.memory_space<vmem>>) attributes {dimension_semantics = [#tpu.dimension_semantics<parallel>], iteration_bounds = array<i64: 1>, scalar_prefetch = 0 : i64, scratch_operands = 0 : i64, tpu.core_type = #tpu.core_type<tc>, window_params = [{transform_indices = @transform_0, window_bounds = array<i64: 288, 32>}, {transform_indices = @transform_1, window_bounds = array<i64: 288, 32>}, {transform_indices = @transform_2, window_bounds = array<i64: 288, 32>}, {transform_indices = @transform_3, window_bounds = array<i64: 288, 32>}, {pipeline_mode = #tpu.pipeline_mode<synchronous>, transform_indices = @transform_4, window_bounds = array<i64: 32, 128>}, {pipeline_mode = #tpu.pipeline_mode<synchronous>, transform_indices = @transform_5, window_bounds = array<i64: 1, 128>}, {transform_indices = @transform_6, window_bounds = array<i64: 288, 128>}]} {
    %c0 = arith.constant 0 : index
    %c0_0 = arith.constant 0 : index
    %0 = vector.load %arg5[%c0, %c0_0] : memref<32x128xf32, #tpu.memory_space<vmem>>, vector<32x128xf32>
    %c0_1 = arith.constant 0 : index
    %c0_2 = arith.constant 0 : index
    %1 = vector.load %arg6[%c0_1, %c0_2] : memref<1x128xf32, #tpu.memory_space<vmem>>, vector<1x128xf32>
    %c0_3 = arith.constant 0 : index
    %c0_4 = arith.constant 0 : index
    %2 = vector.load %arg1[%c0_3, %c0_4] : memref<288x32xf32, #tpu.memory_space<vmem>>, vector<288x32xf32>
    %cst = arith.constant dense<0.000000e+00> : vector<288x128xf32>
    %3 = tpu.matmul %2, %0, %cst {dimension_numbers = #tpu.dot_dimension_numbers<[1], [0], [0], [1], [0, 0, 1, 1], [], []>} : vector<288x32xf32>, vector<32x128xf32>, vector<288x128xf32> -> vector<288x128xf32>
    %4 = vector.broadcast %1 : vector<1x128xf32> to vector<288x128xf32>
    %5 = arith.addf %3, %4 : vector<288x128xf32>
    %cst_5 = arith.constant 0.000000e+00 : f32
    %6 = vector.broadcast %cst_5 : f32 to vector<288x128xf32>
    %7 = arith.maximumf %5, %6 : vector<288x128xf32>
    %c0_6 = arith.constant 0 : index
    %c0_7 = arith.constant 0 : index
    %8 = vector.load %arg2[%c0_6, %c0_7] : memref<288x32xf32, #tpu.memory_space<vmem>>, vector<288x32xf32>
    %cst_8 = arith.constant dense<0.000000e+00> : vector<288x128xf32>
    %9 = tpu.matmul %8, %0, %cst_8 {dimension_numbers = #tpu.dot_dimension_numbers<[1], [0], [0], [1], [0, 0, 1, 1], [], []>} : vector<288x32xf32>, vector<32x128xf32>, vector<288x128xf32> -> vector<288x128xf32>
    %10 = vector.broadcast %1 : vector<1x128xf32> to vector<288x128xf32>
    %11 = arith.addf %9, %10 : vector<288x128xf32>
    %cst_9 = arith.constant 0.000000e+00 : f32
    %12 = vector.broadcast %cst_9 : f32 to vector<288x128xf32>
    %13 = arith.maximumf %11, %12 : vector<288x128xf32>
    %14 = arith.maximumf %7, %13 : vector<288x128xf32>
    %c0_10 = arith.constant 0 : index
    %c0_11 = arith.constant 0 : index
    %15 = vector.load %arg3[%c0_10, %c0_11] : memref<288x32xf32, #tpu.memory_space<vmem>>, vector<288x32xf32>
    %cst_12 = arith.constant dense<0.000000e+00> : vector<288x128xf32>
    %16 = tpu.matmul %15, %0, %cst_12 {dimension_numbers = #tpu.dot_dimension_numbers<[1], [0], [0], [1], [0, 0, 1, 1], [], []>} : vector<288x32xf32>, vector<32x128xf32>, vector<288x128xf32> -> vector<288x128xf32>
    %17 = vector.broadcast %1 : vector<1x128xf32> to vector<288x128xf32>
    %18 = arith.addf %16, %17 : vector<288x128xf32>
    %cst_13 = arith.constant 0.000000e+00 : f32
    %19 = vector.broadcast %cst_13 : f32 to vector<288x128xf32>
    %20 = arith.maximumf %18, %19 : vector<288x128xf32>
    %c0_14 = arith.constant 0 : index
    %c0_15 = arith.constant 0 : index
    %21 = vector.load %arg4[%c0_14, %c0_15] : memref<288x32xf32, #tpu.memory_space<vmem>>, vector<288x32xf32>
    %cst_16 = arith.constant dense<0.000000e+00> : vector<288x128xf32>
    %22 = tpu.matmul %21, %0, %cst_16 {dimension_numbers = #tpu.dot_dimension_numbers<[1], [0], [0], [1], [0, 0, 1, 1], [], []>} : vector<288x32xf32>, vector<32x128xf32>, vector<288x128xf32> -> vector<288x128xf32>
    %23 = vector.broadcast %1 : vector<1x128xf32> to vector<288x128xf32>
    %24 = arith.addf %22, %23 : vector<288x128xf32>
    %cst_17 = arith.constant 0.000000e+00 : f32
    %25 = vector.broadcast %cst_17 : f32 to vector<288x128xf32>
    %26 = arith.maximumf %24, %25 : vector<288x128xf32>
    %27 = arith.maximumf %20, %26 : vector<288x128xf32>
    %28 = arith.maximumf %14, %27 : vector<288x128xf32>
    %c0_18 = arith.constant 0 : index
    %c0_19 = arith.constant 0 : index
    %29 = vector.load %arg7[%c0_18, %c0_19] : memref<288x128xf32, #tpu.memory_space<vmem>>, vector<288x128xf32>
    tpu.vector_store %arg7[%c0_18, %c0_19], %28 {strides = array<i32>} : memref<288x128xf32, #tpu.memory_space<vmem>>, vector<288x128xf32>,
    return
  }
  func.func @transform_0(%arg0: i32) -> (i32, i32) {
    %c0_i32 = arith.constant 0 : i32
    %c0_i32_0 = arith.constant 0 : i32
    return %arg0, %c0_i32 : i32, i32
  }
  func.func @transform_1(%arg0: i32) -> (i32, i32) {
    %c0_i32 = arith.constant 0 : i32
    %c0_i32_0 = arith.constant 0 : i32
    return %arg0, %c0_i32 : i32, i32
  }
  func.func @transform_2(%arg0: i32) -> (i32, i32) {
    %c0_i32 = arith.constant 0 : i32
    %c0_i32_0 = arith.constant 0 : i32
    return %arg0, %c0_i32 : i32, i32
  }
  func.func @transform_3(%arg0: i32) -> (i32, i32) {
    %c0_i32 = arith.constant 0 : i32
    %c0_i32_0 = arith.constant 0 : i32
    return %arg0, %c0_i32 : i32, i32
  }
  func.func @transform_4(%arg0: i32) -> (i32, i32) {
    %c0_i32 = arith.constant 0 : i32
    %c0_i32_0 = arith.constant 0 : i32
    %c0_i32_1 = arith.constant 0 : i32
    return %c0_i32, %c0_i32_0 : i32, i32
  }
  func.func @transform_5(%arg0: i32) -> (i32, i32) {
    %c0_i32 = arith.constant 0 : i32
    %c0_i32_0 = arith.constant 0 : i32
    %c0_i32_1 = arith.constant 0 : i32
    return %c0_i32, %c0_i32_0 : i32, i32
  }
  func.func @transform_6(%arg0: i32) -> (i32, i32) {
    %c0_i32 = arith.constant 0 : i32
    %c0_i32_0 = arith.constant 0 : i32
    return %arg0, %c0_i32 : i32, i32
  }
}

module attributes {stable_mosaic.version = 11 : i64} {
  func.func @_conv_relu_pool_kernel(%arg0: i32, %arg1: memref<32x256xf32, #tpu.memory_space<vmem>>, %arg2: memref<32x256xf32, #tpu.memory_space<vmem>>, %arg3: memref<32x256xf32, #tpu.memory_space<vmem>>, %arg4: memref<32x256xf32, #tpu.memory_space<vmem>>, %arg5: memref<256x128xf32, #tpu.memory_space<vmem>>, %arg6: memref<1x128xf32, #tpu.memory_space<vmem>>, %arg7: memref<32x128xf32, #tpu.memory_space<vmem>>) attributes {dimension_semantics = [#tpu.dimension_semantics<parallel>], iteration_bounds = array<i64: 1>, scalar_prefetch = 0 : i64, scratch_operands = 0 : i64, tpu.core_type = #tpu.core_type<tc>, window_params = [{transform_indices = @transform_0, window_bounds = array<i64: 32, 256>}, {transform_indices = @transform_1, window_bounds = array<i64: 32, 256>}, {transform_indices = @transform_2, window_bounds = array<i64: 32, 256>}, {transform_indices = @transform_3, window_bounds = array<i64: 32, 256>}, {pipeline_mode = #tpu.pipeline_mode<synchronous>, transform_indices = @transform_4, window_bounds = array<i64: 256, 128>}, {pipeline_mode = #tpu.pipeline_mode<synchronous>, transform_indices = @transform_5, window_bounds = array<i64: 1, 128>}, {transform_indices = @transform_6, window_bounds = array<i64: 32, 128>}]} {
    %c0 = arith.constant 0 : index
    %c0_0 = arith.constant 0 : index
    %0 = vector.load %arg5[%c0, %c0_0] : memref<256x128xf32, #tpu.memory_space<vmem>>, vector<256x128xf32>
    %c0_1 = arith.constant 0 : index
    %c0_2 = arith.constant 0 : index
    %1 = vector.load %arg6[%c0_1, %c0_2] : memref<1x128xf32, #tpu.memory_space<vmem>>, vector<1x128xf32>
    %c0_3 = arith.constant 0 : index
    %c0_4 = arith.constant 0 : index
    %2 = vector.load %arg1[%c0_3, %c0_4] : memref<32x256xf32, #tpu.memory_space<vmem>>, vector<32x256xf32>
    %cst = arith.constant dense<0.000000e+00> : vector<32x128xf32>
    %3 = tpu.matmul %2, %0, %cst {dimension_numbers = #tpu.dot_dimension_numbers<[1], [0], [0], [1], [0, 0, 1, 1], [], []>} : vector<32x256xf32>, vector<256x128xf32>, vector<32x128xf32> -> vector<32x128xf32>
    %4 = vector.broadcast %1 : vector<1x128xf32> to vector<32x128xf32>
    %5 = arith.addf %3, %4 : vector<32x128xf32>
    %cst_5 = arith.constant 0.000000e+00 : f32
    %6 = vector.broadcast %cst_5 : f32 to vector<32x128xf32>
    %7 = arith.maximumf %5, %6 : vector<32x128xf32>
    %c0_6 = arith.constant 0 : index
    %c0_7 = arith.constant 0 : index
    %8 = vector.load %arg2[%c0_6, %c0_7] : memref<32x256xf32, #tpu.memory_space<vmem>>, vector<32x256xf32>
    %cst_8 = arith.constant dense<0.000000e+00> : vector<32x128xf32>
    %9 = tpu.matmul %8, %0, %cst_8 {dimension_numbers = #tpu.dot_dimension_numbers<[1], [0], [0], [1], [0, 0, 1, 1], [], []>} : vector<32x256xf32>, vector<256x128xf32>, vector<32x128xf32> -> vector<32x128xf32>
    %10 = vector.broadcast %1 : vector<1x128xf32> to vector<32x128xf32>
    %11 = arith.addf %9, %10 : vector<32x128xf32>
    %cst_9 = arith.constant 0.000000e+00 : f32
    %12 = vector.broadcast %cst_9 : f32 to vector<32x128xf32>
    %13 = arith.maximumf %11, %12 : vector<32x128xf32>
    %14 = arith.maximumf %7, %13 : vector<32x128xf32>
    %c0_10 = arith.constant 0 : index
    %c0_11 = arith.constant 0 : index
    %15 = vector.load %arg3[%c0_10, %c0_11] : memref<32x256xf32, #tpu.memory_space<vmem>>, vector<32x256xf32>
    %cst_12 = arith.constant dense<0.000000e+00> : vector<32x128xf32>
    %16 = tpu.matmul %15, %0, %cst_12 {dimension_numbers = #tpu.dot_dimension_numbers<[1], [0], [0], [1], [0, 0, 1, 1], [], []>} : vector<32x256xf32>, vector<256x128xf32>, vector<32x128xf32> -> vector<32x128xf32>
    %17 = vector.broadcast %1 : vector<1x128xf32> to vector<32x128xf32>
    %18 = arith.addf %16, %17 : vector<32x128xf32>
    %cst_13 = arith.constant 0.000000e+00 : f32
    %19 = vector.broadcast %cst_13 : f32 to vector<32x128xf32>
    %20 = arith.maximumf %18, %19 : vector<32x128xf32>
    %c0_14 = arith.constant 0 : index
    %c0_15 = arith.constant 0 : index
    %21 = vector.load %arg4[%c0_14, %c0_15] : memref<32x256xf32, #tpu.memory_space<vmem>>, vector<32x256xf32>
    %cst_16 = arith.constant dense<0.000000e+00> : vector<32x128xf32>
    %22 = tpu.matmul %21, %0, %cst_16 {dimension_numbers = #tpu.dot_dimension_numbers<[1], [0], [0], [1], [0, 0, 1, 1], [], []>} : vector<32x256xf32>, vector<256x128xf32>, vector<32x128xf32> -> vector<32x128xf32>
    %23 = vector.broadcast %1 : vector<1x128xf32> to vector<32x128xf32>
    %24 = arith.addf %22, %23 : vector<32x128xf32>
    %cst_17 = arith.constant 0.000000e+00 : f32
    %25 = vector.broadcast %cst_17 : f32 to vector<32x128xf32>
    %26 = arith.maximumf %24, %25 : vector<32x128xf32>
    %27 = arith.maximumf %20, %26 : vector<32x128xf32>
    %28 = arith.maximumf %14, %27 : vector<32x128xf32>
    %c0_18 = arith.constant 0 : index
    %c0_19 = arith.constant 0 : index
    %29 = vector.load %arg7[%c0_18, %c0_19] : memref<32x128xf32, #tpu.memory_space<vmem>>, vector<32x128xf32>
    tpu.vector_store %arg7[%c0_18, %c0_19], %28 {strides = array<i32>} : memref<32x128xf32, #tpu.memory_space<vmem>>, vector<32x128xf32>,
    return
  }
  func.func @transform_0(%arg0: i32) -> (i32, i32) {
    %c0_i32 = arith.constant 0 : i32
    %c0_i32_0 = arith.constant 0 : i32
    return %arg0, %c0_i32 : i32, i32
  }
  func.func @transform_1(%arg0: i32) -> (i32, i32) {
    %c0_i32 = arith.constant 0 : i32
    %c0_i32_0 = arith.constant 0 : i32
    return %arg0, %c0_i32 : i32, i32
  }
  func.func @transform_2(%arg0: i32) -> (i32, i32) {
    %c0_i32 = arith.constant 0 : i32
    %c0_i32_0 = arith.constant 0 : i32
    return %arg0, %c0_i32 : i32, i32
  }
  func.func @transform_3(%arg0: i32) -> (i32, i32) {
    %c0_i32 = arith.constant 0 : i32
    %c0_i32_0 = arith.constant 0 : i32
    return %arg0, %c0_i32 : i32, i32
  }
  func.func @transform_4(%arg0: i32) -> (i32, i32) {
    %c0_i32 = arith.constant 0 : i32
    %c0_i32_0 = arith.constant 0 : i32
    %c0_i32_1 = arith.constant 0 : i32
    return %c0_i32, %c0_i32_0 : i32, i32
  }
  func.func @transform_5(%arg0: i32) -> (i32, i32) {
    %c0_i32 = arith.constant 0 : i32
    %c0_i32_0 = arith.constant 0 : i32
    %c0_i32_1 = arith.constant 0 : i32
    return %c0_i32, %c0_i32_0 : i32, i32
  }
  func.func @transform_6(%arg0: i32) -> (i32, i32) {
    %c0_i32 = arith.constant 0 : i32
    %c0_i32_0 = arith.constant 0 : i32
    return %arg0, %c0_i32 : i32, i32
  }
}

module attributes {stable_mosaic.version = 11 : i64} {
  func.func @_fc_chain_kernel(%arg0: i32, %arg1: memref<8x320xf32, #tpu.memory_space<vmem>>, %arg2: memref<320x256xf32, #tpu.memory_space<vmem>>, %arg3: memref<1x256xf32, #tpu.memory_space<vmem>>, %arg4: memref<256x256xf32, #tpu.memory_space<vmem>>, %arg5: memref<1x256xf32, #tpu.memory_space<vmem>>, %arg6: memref<256x128xf32, #tpu.memory_space<vmem>>, %arg7: memref<1x128xf32, #tpu.memory_space<vmem>>, %arg8: memref<8x128xf32, #tpu.memory_space<vmem>>) attributes {dimension_semantics = [#tpu.dimension_semantics<parallel>], iteration_bounds = array<i64: 1>, scalar_prefetch = 0 : i64, scratch_operands = 0 : i64, tpu.core_type = #tpu.core_type<tc>, window_params = [{transform_indices = @transform_0, window_bounds = array<i64: 8, 320>}, {pipeline_mode = #tpu.pipeline_mode<synchronous>, transform_indices = @transform_1, window_bounds = array<i64: 320, 256>}, {pipeline_mode = #tpu.pipeline_mode<synchronous>, transform_indices = @transform_2, window_bounds = array<i64: 1, 256>}, {pipeline_mode = #tpu.pipeline_mode<synchronous>, transform_indices = @transform_3, window_bounds = array<i64: 256, 256>}, {pipeline_mode = #tpu.pipeline_mode<synchronous>, transform_indices = @transform_4, window_bounds = array<i64: 1, 256>}, {pipeline_mode = #tpu.pipeline_mode<synchronous>, transform_indices = @transform_5, window_bounds = array<i64: 256, 128>}, {pipeline_mode = #tpu.pipeline_mode<synchronous>, transform_indices = @transform_6, window_bounds = array<i64: 1, 128>}, {transform_indices = @transform_7, window_bounds = array<i64: 8, 128>}]} {
    %c0 = arith.constant 0 : index
    %c0_0 = arith.constant 0 : index
    %0 = vector.load %arg1[%c0, %c0_0] : memref<8x320xf32, #tpu.memory_space<vmem>>, vector<8x320xf32>
    %c0_1 = arith.constant 0 : index
    %c0_2 = arith.constant 0 : index
    %1 = vector.load %arg2[%c0_1, %c0_2] : memref<320x256xf32, #tpu.memory_space<vmem>>, vector<320x256xf32>
    %cst = arith.constant dense<0.000000e+00> : vector<8x256xf32>
    %2 = tpu.matmul %0, %1, %cst {dimension_numbers = #tpu.dot_dimension_numbers<[1], [0], [0], [1], [0, 0, 1, 1], [], []>} : vector<8x320xf32>, vector<320x256xf32>, vector<8x256xf32> -> vector<8x256xf32>
    %c0_3 = arith.constant 0 : index
    %c0_4 = arith.constant 0 : index
    %3 = vector.load %arg3[%c0_3, %c0_4] : memref<1x256xf32, #tpu.memory_space<vmem>>, vector<1x256xf32>
    %4 = vector.broadcast %3 : vector<1x256xf32> to vector<8x256xf32>
    %5 = arith.addf %2, %4 : vector<8x256xf32>
    %cst_5 = arith.constant 0.000000e+00 : f32
    %6 = vector.broadcast %cst_5 : f32 to vector<8x256xf32>
    %7 = arith.maximumf %5, %6 : vector<8x256xf32>
    %c0_6 = arith.constant 0 : index
    %c0_7 = arith.constant 0 : index
    %8 = vector.load %arg4[%c0_6, %c0_7] : memref<256x256xf32, #tpu.memory_space<vmem>>, vector<256x256xf32>
    %cst_8 = arith.constant dense<0.000000e+00> : vector<8x256xf32>
    %9 = tpu.matmul %7, %8, %cst_8 {dimension_numbers = #tpu.dot_dimension_numbers<[1], [0], [0], [1], [0, 0, 1, 1], [], []>} : vector<8x256xf32>, vector<256x256xf32>, vector<8x256xf32> -> vector<8x256xf32>
    %c0_9 = arith.constant 0 : index
    %c0_10 = arith.constant 0 : index
    %10 = vector.load %arg5[%c0_9, %c0_10] : memref<1x256xf32, #tpu.memory_space<vmem>>, vector<1x256xf32>
    %11 = vector.broadcast %10 : vector<1x256xf32> to vector<8x256xf32>
    %12 = arith.addf %9, %11 : vector<8x256xf32>
    %cst_11 = arith.constant 0.000000e+00 : f32
    %13 = vector.broadcast %cst_11 : f32 to vector<8x256xf32>
    %14 = arith.maximumf %12, %13 : vector<8x256xf32>
    %c0_12 = arith.constant 0 : index
    %c0_13 = arith.constant 0 : index
    %15 = vector.load %arg6[%c0_12, %c0_13] : memref<256x128xf32, #tpu.memory_space<vmem>>, vector<256x128xf32>
    %cst_14 = arith.constant dense<0.000000e+00> : vector<8x128xf32>
    %16 = tpu.matmul %14, %15, %cst_14 {dimension_numbers = #tpu.dot_dimension_numbers<[1], [0], [0], [1], [0, 0, 1, 1], [], []>} : vector<8x256xf32>, vector<256x128xf32>, vector<8x128xf32> -> vector<8x128xf32>
    %c0_15 = arith.constant 0 : index
    %c0_16 = arith.constant 0 : index
    %17 = vector.load %arg7[%c0_15, %c0_16] : memref<1x128xf32, #tpu.memory_space<vmem>>, vector<1x128xf32>
    %18 = vector.broadcast %17 : vector<1x128xf32> to vector<8x128xf32>
    %19 = arith.addf %16, %18 : vector<8x128xf32>
    %cst_17 = arith.constant 0.000000e+00 : f32
    %20 = vector.broadcast %cst_17 : f32 to vector<8x128xf32>
    %21 = arith.maximumf %19, %20 : vector<8x128xf32>
    %c0_18 = arith.constant 0 : index
    %c0_19 = arith.constant 0 : index
    %22 = vector.load %arg8[%c0_18, %c0_19] : memref<8x128xf32, #tpu.memory_space<vmem>>, vector<8x128xf32>
    tpu.vector_store %arg8[%c0_18, %c0_19], %21 {strides = array<i32>} : memref<8x128xf32, #tpu.memory_space<vmem>>, vector<8x128xf32>,
    return
  }
  func.func @transform_0(%arg0: i32) -> (i32, i32) {
    %c0_i32 = arith.constant 0 : i32
    %c0_i32_0 = arith.constant 0 : i32
    return %arg0, %c0_i32 : i32, i32
  }
  func.func @transform_1(%arg0: i32) -> (i32, i32) {
    %c0_i32 = arith.constant 0 : i32
    %c0_i32_0 = arith.constant 0 : i32
    %c0_i32_1 = arith.constant 0 : i32
    return %c0_i32, %c0_i32_0 : i32, i32
  }
  func.func @transform_2(%arg0: i32) -> (i32, i32) {
    %c0_i32 = arith.constant 0 : i32
    %c0_i32_0 = arith.constant 0 : i32
    %c0_i32_1 = arith.constant 0 : i32
    return %c0_i32, %c0_i32_0 : i32, i32
  }
  func.func @transform_3(%arg0: i32) -> (i32, i32) {
    %c0_i32 = arith.constant 0 : i32
    %c0_i32_0 = arith.constant 0 : i32
    %c0_i32_1 = arith.constant 0 : i32
    return %c0_i32, %c0_i32_0 : i32, i32
  }
  func.func @transform_4(%arg0: i32) -> (i32, i32) {
    %c0_i32 = arith.constant 0 : i32
    %c0_i32_0 = arith.constant 0 : i32
    %c0_i32_1 = arith.constant 0 : i32
    return %c0_i32, %c0_i32_0 : i32, i32
  }
  func.func @transform_5(%arg0: i32) -> (i32, i32) {
    %c0_i32 = arith.constant 0 : i32
    %c0_i32_0 = arith.constant 0 : i32
    %c0_i32_1 = arith.constant 0 : i32
    return %c0_i32, %c0_i32_0 : i32, i32
  }
  func.func @transform_6(%arg0: i32) -> (i32, i32) {
    %c0_i32 = arith.constant 0 : i32
    %c0_i32_0 = arith.constant 0 : i32
    %c0_i32_1 = arith.constant 0 : i32
    return %c0_i32, %c0_i32_0 : i32, i32
  }
  func.func @transform_7(%arg0: i32) -> (i32, i32) {
    %c0_i32 = arith.constant 0 : i32
    %c0_i32_0 = arith.constant 0 : i32
    return %arg0, %c0_i32 : i32, i32
  }
}

</mosaic_0001>

<bundles_post_ra>
// kernel: _lambda_.3
= control target key start
LH: loop header
LB: loop body
LE: loop exit
PB: predicated region body
PF: predicated region fallthrough
CT: control target
= control target key end

     0   :  { %vm70_vm0 = vcmask 261120   ;;  %s3426_s4 = inlined_call_operand.vmem [shape: f32[32,128], index: 4, kind: input, shape index: {}]   ;;  %s3427_s0 = inlined_call_operand.vmem [shape: f32[288,32], index: 0, kind: input, shape index: {}]   ;;  %s3428_s1 = inlined_call_operand.vmem [shape: f32[288,32], index: 1, kind: input, shape index: {}]   ;;  %s3429_s2 = inlined_call_operand.vmem [shape: f32[288,32], index: 2, kind: input, shape index: {}]   ;;  %s3430_s3 = inlined_call_operand.vmem [shape: f32[288,32], index: 3, kind: input, shape index: {}]   ;;  %s3431_s5 = inlined_call_operand.vmem [shape: f32[1,128], index: 5, kind: input, shape index: {}]   ;;  %s3432_s6 = inlined_call_operand.vmem [shape: f32[288,128], index: 6, kind: output, shape index: {}]  }
   0x1   :  { %v26_v0 = vld [vmem:[%s3426_s4 + $0x18] sm:$0xff]  ;;  %v25_v1 = vld [vmem:[%s3426_s4 + $0x10] sm:$0xff]  ;;  %v24_v2 = vld [vmem:[%s3426_s4 + $0x8] sm:$0xff] }
   0x2   :  { %2188 = vmatprep.subr.mxu0 %v26_v0  ;;  %2250 = vmatprep.subr.mxu1 %v26_v0  ;;  %v2484_v3 = vld [vmem:[%s3426_s4] sm:$0xff]  ;;  %v29_v6 = vld [vmem:[%s3427_s0 + $0x8] sm:$0xff]  ;;  %v30_v8 = vld [vmem:[%s3427_s0 + $0x10] sm:$0xff] }
   0x3   :  { %2189 = vmatpush3.msra.mxu0 %v26_v0  ;;  %2251 = vmatpush3.msra.mxu1 %v26_v0  ;;  %v28_v4 = vld [vmem:[%s3427_s0] sm:$0xff]  ;;  %v461_v7 = vld [vmem:[%s3428_s1 + $0x8] sm:$0xff]  ;;  %v462_v9 = vld [vmem:[%s3428_s1 + $0x10] sm:$0xff] }
   0x4   :  { %2190 = vmatprep.subr.mxu0 %v25_v1  ;;  %2252 = vmatprep.subr.mxu1 %v25_v1  ;;  %v460_v5 = vld [vmem:[%s3428_s1] sm:$0xff]  ;;  %v31_v10 = vld [vmem:[%s3427_s0 + $0x18] sm:$0xff]  ;;  %v33_v14 = vld [vmem:[%s3427_s0 + $0x28] sm:$0xff] }
   0x5   :  { %2191 = vmatpush3.msra.mxu0 %v25_v1  ;;  %2253 = vmatpush3.msra.mxu1 %v25_v1  ;;  %v463_v11 = vld [vmem:[%s3428_s1 + $0x18] sm:$0xff]  ;;  %v32_v12 = vld [vmem:[%s3427_s0 + $0x20] sm:$0xff]  ;;  %v465_v15 = vld [vmem:[%s3428_s1 + $0x28] sm:$0xff] }
   0x6   :  { %2192 = vmatprep.subr.mxu0 %v24_v2  ;;  %2254 = vmatprep.subr.mxu1 %v24_v2  ;;  %v464_v13 = vld [vmem:[%s3428_s1 + $0x20] sm:$0xff]  ;;  %v34_v16 = vld [vmem:[%s3427_s0 + $0x30] sm:$0xff]  ;;  %v35_v18 = vld [vmem:[%s3427_s0 + $0x38] sm:$0xff] }
   0x7   :  { %2193 = vmatpush3.msra.mxu0 %v24_v2  ;;  %2255 = vmatpush3.msra.mxu1 %v24_v2  ;;  %v466_v17 = vld [vmem:[%s3428_s1 + $0x30] sm:$0xff]  ;;  %v467_v19 = vld [vmem:[%s3428_s1 + $0x38] sm:$0xff]  ;;  %v36_v20 = vld [vmem:[%s3427_s0 + $0x40] sm:$0xff] }
   0x8   :  { %2194 = vmatprep.subr.mxu0 %v2484_v3  ;;  %2256 = vmatprep.subr.mxu1 %v2484_v3  ;;  %v468_v21 = vld [vmem:[%s3428_s1 + $0x40] sm:$0xff]  ;;  %v37_v22 = vld [vmem:[%s3427_s0 + $0x48] sm:$0xff]  ;;  %v38_v24 = vld [vmem:[%s3427_s0 + $0x50] sm:$0xff] }
   0x9   :  { %2195 = vmatpush3.msra.mxu0 %v2484_v3  ;;  %2196 = vmatprep.mubr.msk.f32.mxu0 %vm70_vm0, %v28_v4  ;;  %v469_v23 = vld [vmem:[%s3428_s1 + $0x48] sm:$0xff]  ;;  %v470_v25 = vld [vmem:[%s3428_s1 + $0x50] sm:$0xff]  ;;  %v39_v26 = vld [vmem:[%s3427_s0 + $0x58] sm:$0xff] }
   0xa   :  { %2257 = vmatpush3.msra.mxu1 %v2484_v3  ;;  %2258 = vmatprep.mubr.msk.f32.mxu1 %vm70_vm0, %v460_v5  ;;  %v471_v27 = vld [vmem:[%s3428_s1 + $0x58] sm:$0xff]  ;;  %v40_v28 = vld [vmem:[%s3427_s0 + $0x60] sm:$0xff]  ;;  %v41_v30 = vld [vmem:[%s3427_s0 + $0x68] sm:$0xff] }
   0xb   :  { %2197 = vmatmul.mubr.msk.f32.vlgmr.msra.gmra.mxu0 %vm70_vm0, %v29_v6  ;;  %2259 = vmatmul.mubr.msk.f32.vlgmr.msra.gmra.mxu1 %vm70_vm0, %v461_v7  ;;  %v472_v29 = vld [vmem:[%s3428_s1 + $0x60] sm:$0xff]  ;;  %v473_v31 = vld [vmem:[%s3428_s1 + $0x68] sm:$0xff]  ;;  %v42_v32 = vld [vmem:[%s3427_s0 + $0x70] sm:$0xff] }
   0xc   :  { %2312 = vmatprep.subr.mxu0 %v26_v0  ;;  %2374 = vmatprep.subr.mxu1 %v26_v0  ;;  %v474_v33 = vld [vmem:[%s3428_s1 + $0x70] sm:$0xff]  ;;  %v43_v34 = vld [vmem:[%s3427_s0 + $0x78] sm:$0xff]  ;;  %v44_v36 = vld [vmem:[%s3427_s0 + $0x80] sm:$0xff] }
   0xd   :  { %2313 = vmatpush3.msra.mxu0 %v26_v0  ;;  %2375 = vmatpush3.msra.mxu1 %v26_v0  ;;  %v475_v35 = vld [vmem:[%s3428_s1 + $0x78] sm:$0xff]  ;;  %v476_v37 = vld [vmem:[%s3428_s1 + $0x80] sm:$0xff]  ;;  %v45_v38 = vld [vmem:[%s3427_s0 + $0x88] sm:$0xff] }
   0xe   :  { %2199 = vmatprep.mubr.msk.f32.mxu0 %vm70_vm0, %v30_v8  ;;  %2261 = vmatprep.mubr.msk.f32.mxu1 %vm70_vm0, %v462_v9  ;;  %v477_v39 = vld [vmem:[%s3428_s1 + $0x88] sm:$0xff]  ;;  %v46_v40 = vld [vmem:[%s3427_s0 + $0x90] sm:$0xff]  ;;  %v47_v42 = vld [vmem:[%s3427_s0 + $0x98] sm:$0xff] }
   0xf   :  { %2200 = vmatmul.mubr.msk.f32.gmra.mxu0 %vm70_vm0, %v31_v10  ;;  %2262 = vmatmul.mubr.msk.f32.gmra.mxu1 %vm70_vm0, %v463_v11  ;;  %v478_v41 = vld [vmem:[%s3428_s1 + $0x90] sm:$0xff]  ;;  %v479_v43 = vld [vmem:[%s3428_s1 + $0x98] sm:$0xff]  ;;  %v48_v44 = vld [vmem:[%s3427_s0 + $0xa0] sm:$0xff] }
  0x10   :  { %2202 = vmatprep.mubr.msk.f32.mxu0 %vm70_vm0, %v32_v12  ;;  %2264 = vmatprep.mubr.msk.f32.mxu1 %vm70_vm0, %v464_v13  ;;  %v480_v45 = vld [vmem:[%s3428_s1 + $0xa0] sm:$0xff]  ;;  %v49_v46 = vld [vmem:[%s3427_s0 + $0xa8] sm:$0xff]  ;;  %v50_v48 = vld [vmem:[%s3427_s0 + $0xb0] sm:$0xff] }
  0x11   :  { %2314 = vmatprep.subr.mxu0 %v25_v1  ;;  %2376 = vmatprep.subr.mxu1 %v25_v1  ;;  %v481_v47 = vld [vmem:[%s3428_s1 + $0xa8] sm:$0xff]  ;;  %v482_v49 = vld [vmem:[%s3428_s1 + $0xb0] sm:$0xff]  ;;  %v51_v50 = vld [vmem:[%s3427_s0 + $0xb8] sm:$0xff] }
  0x12   :  { %2315 = vmatpush3.msra.mxu0 %v25_v1  ;;  %2377 = vmatpush3.msra.mxu1 %v25_v1  ;;  %v483_v51 = vld [vmem:[%s3428_s1 + $0xb8] sm:$0xff]  ;;  %v52_v52 = vld [vmem:[%s3427_s0 + $0xc0] sm:$0xff]  ;;  %v53_v54 = vld [vmem:[%s3427_s0 + $0xc8] sm:$0xff] }
  0x13   :  { %2203 = vmatmul.mubr.msk.f32.gmra.mxu0 %vm70_vm0, %v33_v14  ;;  %2265 = vmatmul.mubr.msk.f32.gmra.mxu1 %vm70_vm0, %v465_v15  ;;  %v484_v53 = vld [vmem:[%s3428_s1 + $0xc0] sm:$0xff]  ;;  %v485_v55 = vld [vmem:[%s3428_s1 + $0xc8] sm:$0xff]  ;;  %v54_v56 = vld [vmem:[%s3427_s0 + $0xd0] sm:$0xff] }
  0x14   :  { %2205 = vmatprep.mubr.msk.f32.mxu0 %vm70_vm0, %v34_v16  ;;  %2267 = vmatprep.mubr.msk.f32.mxu1 %vm70_vm0, %v466_v17  ;;  %v486_v57 = vld [vmem:[%s3428_s1 + $0xd0] sm:$0xff]  ;;  %v55_v58 = vld [vmem:[%s3427_s0 + $0xd8] sm:$0xff]  ;;  %v56_v60 = vld [vmem:[%s3427_s0 + $0xe0] sm:$0xff] }
  0x15   :  { %2316 = vmatprep.subr.mxu0 %v24_v2  ;;  %2378 = vmatprep.subr.mxu1 %v24_v2  ;;  %v487_v59 = vld [vmem:[%s3428_s1 + $0xd8] sm:$0xff]  ;;  %v488_v61 = vld [vmem:[%s3428_s1 + $0xe0] sm:$0xff]  ;;  %v57_v62 = vld [vmem:[%s3427_s0 + $0xe8] sm:$0xff] }
  0x16   :  { %2317 = vmatpush3.msra.mxu0 %v24_v2  ;;  %2379 = vmatpush3.msra.mxu1 %v24_v2  ;;  %v489_v63 = vld [vmem:[%s3428_s1 + $0xe8] sm:$0xff]  ;;  %v58_v0 = vld [vmem:[%s3427_s0 + $0xf0] sm:$0xff]  ;;  %v59_v2 = vld [vmem:[%s3427_s0 + $0xf8] sm:$0xff] }
  0x17   :  { %2206 = vmatmul.mubr.msk.f32.gmra.mxu0 %vm70_vm0, %v35_v18  ;;  %2268 = vmatmul.mubr.msk.f32.gmra.mxu1 %vm70_vm0, %v467_v19  ;;  %v490_v1 = vld [vmem:[%s3428_s1 + $0xf0] sm:$0xff]  ;;  %v60_v4 = vld [vmem:[%s3427_s0 + $0x100] sm:$0xff]  ;;  %v61_v6 = vld [vmem:[%s3427_s0 + $0x108] sm:$0xff] }
  0x18   :  { %2208 = vmatprep.mubr.msk.f32.mxu0 %vm70_vm0, %v36_v20  ;;  %2270 = vmatprep.mubr.msk.f32.mxu1 %vm70_vm0, %v468_v21  ;;  %v492_v5 = vld [vmem:[%s3428_s1 + $0x100] sm:$0xff]  ;;  %v493_v7 = vld [vmem:[%s3428_s1 + $0x108] sm:$0xff]  ;;  %v62_v8 = vld [vmem:[%s3427_s0 + $0x110] sm:$0xff] }
  0x19   :  { %2318 = vmatprep.subr.mxu0 %v2484_v3  ;;  %2380 = vmatprep.subr.mxu1 %v2484_v3  ;;  %v494_v9 = vld [vmem:[%s3428_s1 + $0x110] sm:$0xff]  ;;  %v63_v10 = vld [vmem:[%s3427_s0 + $0x118] sm:$0xff]  ;;  %v921_v12 = vld [vmem:[%s3429_s2] sm:$0xff] }
  0x1a   :  { %2319 = vmatpush3.msra.mxu0 %v2484_v3  ;;  %2381 = vmatpush3.msra.mxu1 %v2484_v3  ;;  %v491_v3 = vld [vmem:[%s3428_s1 + $0xf8] sm:$0xff]  ;;  %v1346_v13 = vld [vmem:[%s3430_s3] sm:$0xff]  ;;  %v922_v14 = vld [vmem:[%s3429_s2 + $0x8] sm:$0xff] }
  0x1b   :  { %2209 = vmatmul.mubr.msk.f32.gmra.mxu0 %vm70_vm0, %v37_v22  ;;  %2271 = vmatmul.mubr.msk.f32.gmra.mxu1 %vm70_vm0, %v469_v23  ;;  %v495_v11 = vld [vmem:[%s3428_s1 + $0x118] sm:$0xff]  ;;  %v1347_v15 = vld [vmem:[%s3430_s3 + $0x8] sm:$0xff]  ;;  %v923_v16 = vld [vmem:[%s3429_s2 + $0x10] sm:$0xff] }
  0x1c   :  { %2211 = vmatprep.mubr.msk.f32.mxu0 %vm70_vm0, %v38_v24  ;;  %2273 = vmatprep.mubr.msk.f32.mxu1 %vm70_vm0, %v470_v25  ;;  %v1348_v17 = vld [vmem:[%s3430_s3 + $0x10] sm:$0xff]  ;;  %v924_v18 = vld [vmem:[%s3429_s2 + $0x18] sm:$0xff]  ;;  %v925_v20 = vld [vmem:[%s3429_s2 + $0x20] sm:$0xff] }
  0x1d   :  { %v1349_v19 = vld [vmem:[%s3430_s3 + $0x18] sm:$0xff]  ;;  %v1350_v21 = vld [vmem:[%s3430_s3 + $0x20] sm:$0xff]  ;;  %v926_v22 = vld [vmem:[%s3429_s2 + $0x28] sm:$0xff] }
  0x1e   :  { %v1351_v23 = vld [vmem:[%s3430_s3 + $0x28] sm:$0xff]  ;;  %v927_v24 = vld [vmem:[%s3429_s2 + $0x30] sm:$0xff] }
  0x1f   :  { %2212 = vmatmul.mubr.msk.f32.gmra.mxu0 %vm70_vm0, %v39_v26  ;;  %2274 = vmatmul.mubr.msk.f32.gmra.mxu1 %vm70_vm0, %v471_v27  ;;  %v1352_v25 = vld [vmem:[%s3430_s3 + $0x30] sm:$0xff]  ;;  %v928_v26 = vld [vmem:[%s3429_s2 + $0x38] sm:$0xff] }
  0x20   :  { %2214 = vmatprep.mubr.msk.f32.mxu0 %vm70_vm0, %v40_v28  ;;  %2276 = vmatprep.mubr.msk.f32.mxu1 %vm70_vm0, %v472_v29  ;;  %v1353_v27 = vld [vmem:[%s3430_s3 + $0x38] sm:$0xff]  ;;  %v929_v28 = vld [vmem:[%s3429_s2 + $0x40] sm:$0xff] }
  0x21   :  { %v1354_v29 = vld [vmem:[%s3430_s3 + $0x40] sm:$0xff] }
  0x23   :  { %2215 = vmatmul.mubr.msk.f32.gmra.mxu0 %vm70_vm0, %v41_v30  ;;  %2277 = vmatmul.mubr.msk.f32.gmra.mxu1 %vm70_vm0, %v473_v31  ;;  %v930_v30 = vld [vmem:[%s3429_s2 + $0x48] sm:$0xff] }
  0x24   :  { %2217 = vmatprep.mubr.msk.f32.mxu0 %vm70_vm0, %v42_v32  ;;  %2279 = vmatprep.mubr.msk.f32.mxu1 %vm70_vm0, %v474_v33  ;;  %v1355_v31 = vld [vmem:[%s3430_s3 + $0x48] sm:$0xff]  ;;  %v931_v32 = vld [vmem:[%s3429_s2 + $0x50] sm:$0xff] }
  0x25   :  { %v1356_v33 = vld [vmem:[%s3430_s3 + $0x50] sm:$0xff] }
  0x27   :  { %2218 = vmatmul.mubr.msk.f32.gmra.mxu0 %vm70_vm0, %v43_v34  ;;  %2280 = vmatmul.mubr.msk.f32.gmra.mxu1 %vm70_vm0, %v475_v35  ;;  %v932_v34 = vld [vmem:[%s3429_s2 + $0x58] sm:$0xff] }
  0x28   :  { %2220 = vmatprep.mubr.msk.f32.mxu0 %vm70_vm0, %v44_v36  ;;  %2282 = vmatprep.mubr.msk.f32.mxu1 %vm70_vm0, %v476_v37  ;;  %v1357_v35 = vld [vmem:[%s3430_s3 + $0x58] sm:$0xff]  ;;  %v933_v36 = vld [vmem:[%s3429_s2 + $0x60] sm:$0xff] }
  0x29   :  { %v1358_v37 = vld [vmem:[%s3430_s3 + $0x60] sm:$0xff] }
  0x2b   :  { %2221 = vmatmul.mubr.msk.f32.gmra.mxu0 %vm70_vm0, %v45_v38  ;;  %2283 = vmatmul.mubr.msk.f32.gmra.mxu1 %vm70_vm0, %v477_v39  ;;  %v934_v38 = vld [vmem:[%s3429_s2 + $0x68] sm:$0xff] }
  0x2c   :  { %2223 = vmatprep.mubr.msk.f32.mxu0 %vm70_vm0, %v46_v40  ;;  %2285 = vmatprep.mubr.msk.f32.mxu1 %vm70_vm0, %v478_v41  ;;  %v1359_v39 = vld [vmem:[%s3430_s3 + $0x68] sm:$0xff]  ;;  %v935_v40 = vld [vmem:[%s3429_s2 + $0x70] sm:$0xff] }
  0x2d   :  { %v1360_v41 = vld [vmem:[%s3430_s3 + $0x70] sm:$0xff] }
  0x2f   :  { %2224 = vmatmul.mubr.msk.f32.gmra.mxu0 %vm70_vm0, %v47_v42  ;;  %2286 = vmatmul.mubr.msk.f32.gmra.mxu1 %vm70_vm0, %v479_v43  ;;  %v936_v42 = vld [vmem:[%s3429_s2 + $0x78] sm:$0xff] }
  0x30   :  { %2226 = vmatprep.mubr.msk.f32.mxu0 %vm70_vm0, %v48_v44  ;;  %2288 = vmatprep.mubr.msk.f32.mxu1 %vm70_vm0, %v480_v45  ;;  %v1361_v43 = vld [vmem:[%s3430_s3 + $0x78] sm:$0xff]  ;;  %v937_v44 = vld [vmem:[%s3429_s2 + $0x80] sm:$0xff] }
  0x31   :  { %v1362_v45 = vld [vmem:[%s3430_s3 + $0x80] sm:$0xff] }
  0x33   :  { %2227 = vmatmul.mubr.msk.f32.gmra.mxu0 %vm70_vm0, %v49_v46  ;;  %2289 = vmatmul.mubr.msk.f32.gmra.mxu1 %vm70_vm0, %v481_v47  ;;  %v938_v46 = vld [vmem:[%s3429_s2 + $0x88] sm:$0xff] }
  0x34   :  { %2229 = vmatprep.mubr.msk.f32.mxu0 %vm70_vm0, %v50_v48  ;;  %2291 = vmatprep.mubr.msk.f32.mxu1 %vm70_vm0, %v482_v49  ;;  %v1363_v47 = vld [vmem:[%s3430_s3 + $0x88] sm:$0xff]  ;;  %v939_v48 = vld [vmem:[%s3429_s2 + $0x90] sm:$0xff] }
  0x35   :  { %v1364_v49 = vld [vmem:[%s3430_s3 + $0x90] sm:$0xff] }
  0x37   :  { %2230 = vmatmul.mubr.msk.f32.gmra.mxu0 %vm70_vm0, %v51_v50  ;;  %2292 = vmatmul.mubr.msk.f32.gmra.mxu1 %vm70_vm0, %v483_v51  ;;  %v940_v50 = vld [vmem:[%s3429_s2 + $0x98] sm:$0xff] }
  0x38   :  { %2232 = vmatprep.mubr.msk.f32.mxu0 %vm70_vm0, %v52_v52  ;;  %2294 = vmatprep.mubr.msk.f32.mxu1 %vm70_vm0, %v484_v53  ;;  %v1365_v51 = vld [vmem:[%s3430_s3 + $0x98] sm:$0xff]  ;;  %v941_v52 = vld [vmem:[%s3429_s2 + $0xa0] sm:$0xff] }
  0x39   :  { %v1366_v53 = vld [vmem:[%s3430_s3 + $0xa0] sm:$0xff] }
  0x3b   :  { %2233 = vmatmul.mubr.msk.f32.gmra.mxu0 %vm70_vm0, %v53_v54  ;;  %2295 = vmatmul.mubr.msk.f32.gmra.mxu1 %vm70_vm0, %v485_v55  ;;  %v942_v54 = vld [vmem:[%s3429_s2 + $0xa8] sm:$0xff] }
  0x3c   :  { %2235 = vmatprep.mubr.msk.f32.mxu0 %vm70_vm0, %v54_v56  ;;  %2297 = vmatprep.mubr.msk.f32.mxu1 %vm70_vm0, %v486_v57  ;;  %v1367_v55 = vld [vmem:[%s3430_s3 + $0xa8] sm:$0xff]  ;;  %v943_v56 = vld [vmem:[%s3429_s2 + $0xb0] sm:$0xff] }
  0x3d   :  { %v1368_v57 = vld [vmem:[%s3430_s3 + $0xb0] sm:$0xff] }
  0x3f   :  { %2236 = vmatmul.mubr.msk.f32.gmra.mxu0 %vm70_vm0, %v55_v58  ;;  %2298 = vmatmul.mubr.msk.f32.gmra.mxu1 %vm70_vm0, %v487_v59  ;;  %v944_v58 = vld [vmem:[%s3429_s2 + $0xb8] sm:$0xff] }
  0x40   :  { %2238 = vmatprep.mubr.msk.f32.mxu0 %vm70_vm0, %v56_v60  ;;  %2300 = vmatprep.mubr.msk.f32.mxu1 %vm70_vm0, %v488_v61  ;;  %v1369_v59 = vld [vmem:[%s3430_s3 + $0xb8] sm:$0xff]  ;;  %v945_v60 = vld [vmem:[%s3429_s2 + $0xc0] sm:$0xff] }
  0x41   :  { %v1370_v61 = vld [vmem:[%s3430_s3 + $0xc0] sm:$0xff] }
  0x43   :  { %2239 = vmatmul.mubr.msk.f32.gmra.mxu0 %vm70_vm0, %v57_v62  ;;  %2301 = vmatmul.mubr.msk.f32.gmra.mxu1 %vm70_vm0, %v489_v63  ;;  %v946_v62 = vld [vmem:[%s3429_s2 + $0xc8] sm:$0xff] }
  0x44   :  { %2241 = vmatprep.mubr.msk.f32.mxu0 %vm70_vm0, %v58_v0  ;;  %2303 = vmatprep.mubr.msk.f32.mxu1 %vm70_vm0, %v490_v1  ;;  %v1371_v63 = vld [vmem:[%s3430_s3 + $0xc8] sm:$0xff]  ;;  %v947_v0 = vld [vmem:[%s3429_s2 + $0xd0] sm:$0xff] }
  0x45   :  { %v1372_v1 = vld [vmem:[%s3430_s3 + $0xd0] sm:$0xff] }
  0x47   :  { %2242 = vmatmul.mubr.msk.f32.gmra.mxu0 %vm70_vm0, %v59_v2  ;;  %2304 = vmatmul.mubr.msk.f32.gmra.mxu1 %vm70_vm0, %v491_v3  ;;  %v948_v2 = vld [vmem:[%s3429_s2 + $0xd8] sm:$0xff] }
  0x48   :  { %2244 = vmatprep.mubr.msk.f32.mxu0 %vm70_vm0, %v60_v4  ;;  %2306 = vmatprep.mubr.msk.f32.mxu1 %vm70_vm0, %v492_v5  ;;  %v1373_v3 = vld [vmem:[%s3430_s3 + $0xd8] sm:$0xff]  ;;  %v949_v4 = vld [vmem:[%s3429_s2 + $0xe0] sm:$0xff] }
  0x49   :  { %v1374_v5 = vld [vmem:[%s3430_s3 + $0xe0] sm:$0xff] }
  0x4b   :  { %2245 = vmatmul.mubr.msk.f32.gmra.mxu0 %vm70_vm0, %v61_v6  ;;  %2307 = vmatmul.mubr.msk.f32.gmra.mxu1 %vm70_vm0, %v493_v7  ;;  %v950_v6 = vld [vmem:[%s3429_s2 + $0xe8] sm:$0xff] }
  0x4c   :  { %2247 = vmatprep.mubr.msk.f32.mxu0 %vm70_vm0, %v62_v8  ;;  %2309 = vmatprep.mubr.msk.f32.mxu1 %vm70_vm0, %v494_v9  ;;  %v1375_v7 = vld [vmem:[%s3430_s3 + $0xe8] sm:$0xff]  ;;  %v951_v8 = vld [vmem:[%s3429_s2 + $0xf0] sm:$0xff] }
  0x4d   :  { %v1376_v9 = vld [vmem:[%s3430_s3 + $0xf0] sm:$0xff] }
  0x4f   :  { %2248 = vmatmul.mubr.msk.f32.gmra.mxu0 %vm70_vm0, %v63_v10  ;;  %2310 = vmatmul.mubr.msk.f32.gmra.mxu1 %vm70_vm0, %v495_v11  ;;  %v952_v10 = vld [vmem:[%s3429_s2 + $0xf8] sm:$0xff] }
  0x50   :  { %2320 = vmatprep.mubr.msk.f32.mxu0 %vm70_vm0, %v921_v12  ;;  %2382 = vmatprep.mubr.msk.f32.mxu1 %vm70_vm0, %v1346_v13  ;;  %v1377_v11 = vld [vmem:[%s3430_s3 + $0xf8] sm:$0xff]  ;;  %v953_v12 = vld [vmem:[%s3429_s2 + $0x100] sm:$0xff] }
  0x51   :  { %v1378_v13 = vld [vmem:[%s3430_s3 + $0x100] sm:$0xff] }
  0x53   :  { %2321 = vmatmul.mubr.msk.f32.vlgmr.msra.gmra.mxu0 %vm70_vm0, %v922_v14  ;;  %2383 = vmatmul.mubr.msk.f32.vlgmr.msra.gmra.mxu1 %vm70_vm0, %v1347_v15  ;;  %v954_v14 = vld [vmem:[%s3429_s2 + $0x108] sm:$0xff] }
  0x54   :  { %2323 = vmatprep.mubr.msk.f32.mxu0 %vm70_vm0, %v923_v16  ;;  %2385 = vmatprep.mubr.msk.f32.mxu1 %vm70_vm0, %v1348_v17  ;;  %v1379_v15 = vld [vmem:[%s3430_s3 + $0x108] sm:$0xff]  ;;  %v955_v16 = vld [vmem:[%s3429_s2 + $0x110] sm:$0xff] }
  0x55   :  { %v1380_v17 = vld [vmem:[%s3430_s3 + $0x110] sm:$0xff] }
  0x57   :  { %2324 = vmatmul.mubr.msk.f32.gmra.mxu0 %vm70_vm0, %v924_v18  ;;  %2386 = vmatmul.mubr.msk.f32.gmra.mxu1 %vm70_vm0, %v1349_v19  ;;  %v956_v18 = vld [vmem:[%s3429_s2 + $0x118] sm:$0xff] }
  0x58   :  { %2326 = vmatprep.mubr.msk.f32.mxu0 %vm70_vm0, %v925_v20  ;;  %2388 = vmatprep.mubr.msk.f32.mxu1 %vm70_vm0, %v1350_v21  ;;  %v1381_v19 = vld [vmem:[%s3430_s3 + $0x118] sm:$0xff]  ;;  %v3073_v20 = vld [vmem:[%s3431_s5] ss:$0 sm:$0xff] }
  0x5b   :  { %2327 = vmatmul.mubr.msk.f32.gmra.mxu0 %vm70_vm0, %v926_v22  ;;  %2389 = vmatmul.mubr.msk.f32.gmra.mxu1 %vm70_vm0, %v1351_v23 }
  0x5c   :  { %2329 = vmatprep.mubr.msk.f32.mxu0 %vm70_vm0, %v927_v24  ;;  %2391 = vmatprep.mubr.msk.f32.mxu1 %vm70_vm0, %v1352_v25 }
  0x5f   :  { %2330 = vmatmul.mubr.msk.f32.gmra.mxu0 %vm70_vm0, %v928_v26  ;;  %2392 = vmatmul.mubr.msk.f32.gmra.mxu1 %vm70_vm0, %v1353_v27 }
  0x60   :  { %2332 = vmatprep.mubr.msk.f32.mxu0 %vm70_vm0, %v929_v28  ;;  %2394 = vmatprep.mubr.msk.f32.mxu1 %vm70_vm0, %v1354_v29 }
  0x63   :  { %2333 = vmatmul.mubr.msk.f32.gmra.mxu0 %vm70_vm0, %v930_v30  ;;  %2395 = vmatmul.mubr.msk.f32.gmra.mxu1 %vm70_vm0, %v1355_v31 }
  0x64   :  { %2335 = vmatprep.mubr.msk.f32.mxu0 %vm70_vm0, %v931_v32  ;;  %2397 = vmatprep.mubr.msk.f32.mxu1 %vm70_vm0, %v1356_v33 }
  0x67   :  { %2336 = vmatmul.mubr.msk.f32.gmra.mxu0 %vm70_vm0, %v932_v34  ;;  %2398 = vmatmul.mubr.msk.f32.gmra.mxu1 %vm70_vm0, %v1357_v35 }
  0x68   :  { %2338 = vmatprep.mubr.msk.f32.mxu0 %vm70_vm0, %v933_v36  ;;  %2400 = vmatprep.mubr.msk.f32.mxu1 %vm70_vm0, %v1358_v37 }
  0x6b   :  { %2339 = vmatmul.mubr.msk.f32.gmra.mxu0 %vm70_vm0, %v934_v38  ;;  %2401 = vmatmul.mubr.msk.f32.gmra.mxu1 %vm70_vm0, %v1359_v39 }
  0x6c   :  { %2341 = vmatprep.mubr.msk.f32.mxu0 %vm70_vm0, %v935_v40  ;;  %2403 = vmatprep.mubr.msk.f32.mxu1 %vm70_vm0, %v1360_v41 }
  0x6f   :  { %2342 = vmatmul.mubr.msk.f32.gmra.mxu0 %vm70_vm0, %v936_v42  ;;  %2404 = vmatmul.mubr.msk.f32.gmra.mxu1 %vm70_vm0, %v1361_v43 }
  0x70   :  { %2344 = vmatprep.mubr.msk.f32.mxu0 %vm70_vm0, %v937_v44  ;;  %2406 = vmatprep.mubr.msk.f32.mxu1 %vm70_vm0, %v1362_v45 }
  0x73   :  { %2345 = vmatmul.mubr.msk.f32.gmra.mxu0 %vm70_vm0, %v938_v46  ;;  %2407 = vmatmul.mubr.msk.f32.gmra.mxu1 %vm70_vm0, %v1363_v47 }
  0x74   :  { %2347 = vmatprep.mubr.msk.f32.mxu0 %vm70_vm0, %v939_v48  ;;  %2409 = vmatprep.mubr.msk.f32.mxu1 %vm70_vm0, %v1364_v49 }
  0x77   :  { %2348 = vmatmul.mubr.msk.f32.gmra.mxu0 %vm70_vm0, %v940_v50  ;;  %2410 = vmatmul.mubr.msk.f32.gmra.mxu1 %vm70_vm0, %v1365_v51 }
  0x78   :  { %2350 = vmatprep.mubr.msk.f32.mxu0 %vm70_vm0, %v941_v52  ;;  %2412 = vmatprep.mubr.msk.f32.mxu1 %vm70_vm0, %v1366_v53 }
  0x7b   :  { %2351 = vmatmul.mubr.msk.f32.gmra.mxu0 %vm70_vm0, %v942_v54  ;;  %2413 = vmatmul.mubr.msk.f32.gmra.mxu1 %vm70_vm0, %v1367_v55 }
  0x7c   :  { %2353 = vmatprep.mubr.msk.f32.mxu0 %vm70_vm0, %v943_v56  ;;  %2415 = vmatprep.mubr.msk.f32.mxu1 %vm70_vm0, %v1368_v57 }
  0x7f   :  { %2354 = vmatmul.mubr.msk.f32.gmra.mxu0 %vm70_vm0, %v944_v58  ;;  %2416 = vmatmul.mubr.msk.f32.gmra.mxu1 %vm70_vm0, %v1369_v59 }
  0x80   :  { %2356 = vmatprep.mubr.msk.f32.mxu0 %vm70_vm0, %v945_v60  ;;  %2418 = vmatprep.mubr.msk.f32.mxu1 %vm70_vm0, %v1370_v61 }
  0x83   :  { %2357 = vmatmul.mubr.msk.f32.gmra.mxu0 %vm70_vm0, %v946_v62  ;;  %2419 = vmatmul.mubr.msk.f32.gmra.mxu1 %vm70_vm0, %v1371_v63 }
  0x84   :  { %2359 = vmatprep.mubr.msk.f32.mxu0 %vm70_vm0, %v947_v0  ;;  %2421 = vmatprep.mubr.msk.f32.mxu1 %vm70_vm0, %v1372_v1 }
  0x87   :  { %2360 = vmatmul.mubr.msk.f32.gmra.mxu0 %vm70_vm0, %v948_v2  ;;  %2422 = vmatmul.mubr.msk.f32.gmra.mxu1 %vm70_vm0, %v1373_v3 }
  0x88   :  { %2362 = vmatprep.mubr.msk.f32.mxu0 %vm70_vm0, %v949_v4  ;;  %2424 = vmatprep.mubr.msk.f32.mxu1 %vm70_vm0, %v1374_v5 }
  0x8b   :  { %2363 = vmatmul.mubr.msk.f32.gmra.mxu0 %vm70_vm0, %v950_v6  ;;  %2425 = vmatmul.mubr.msk.f32.gmra.mxu1 %vm70_vm0, %v1375_v7 }
  0x8c   :  { %2365 = vmatprep.mubr.msk.f32.mxu0 %vm70_vm0, %v951_v8  ;;  %2427 = vmatprep.mubr.msk.f32.mxu1 %vm70_vm0, %v1376_v9 }
  0x8f   :  { %2366 = vmatmul.mubr.msk.f32.gmra.mxu0 %vm70_vm0, %v952_v10  ;;  %2428 = vmatmul.mubr.msk.f32.gmra.mxu1 %vm70_vm0, %v1377_v11 }
  0x90   :  { %2368 = vmatprep.mubr.msk.f32.mxu0 %vm70_vm0, %v953_v12  ;;  %2430 = vmatprep.mubr.msk.f32.mxu1 %vm70_vm0, %v1378_v13 }
  0x93   :  { %2369 = vmatmul.mubr.msk.f32.gmra.mxu0 %vm70_vm0, %v954_v14  ;;  %2431 = vmatmul.mubr.msk.f32.gmra.mxu1 %vm70_vm0, %v1379_v15 }
  0x94   :  { %2371 = vmatprep.mubr.msk.f32.mxu0 %vm70_vm0, %v955_v16  ;;  %2433 = vmatprep.mubr.msk.f32.mxu1 %vm70_vm0, %v1380_v17 }
  0x97   :  { %2372 = vmatmul.mubr.msk.f32.gmra.mxu0 %vm70_vm0, %v956_v18  ;;  %2434 = vmatmul.mubr.msk.f32.gmra.mxu1 %vm70_vm0, %v1381_v19 }
  0xcb   :  { %v2198_v21 = vpop.f32.mrf.mxu0  ;;  %v2260_v22 = vpop.f32.mrf.mxu1 }
  0xcc   :  { %v251_v23 = vadd.f32 %v2198_v21, %v3073_v20  ;;  %v676_v24 = vadd.f32 %v2260_v22, %v3073_v20 }
  0xcd   :  { %v245_v25 = vpop.f32.mrf.mxu0  ;;  %v670_v26 = vpop.f32.mrf.mxu1 }
  0xce   :  { %v425_v27 = vmax.f32 %v251_v23, 0.0  ;;  %v850_v28 = vmax.f32 %v676_v24, 0.0  ;;  %v246_v29 = vadd.f32 %v3073_v20, %v245_v25  ;;  %v671_v30 = vadd.f32 %v3073_v20, %v670_v26 }
  0xcf   :  { %v2201_v31 = vpop.f32.mrf.mxu0  ;;  %v2263_v32 = vpop.f32.mrf.mxu1 }
  0xd0   :  { %v3079_v33 = vmax.f32 %v425_v27, %v850_v28  ;;  %v424_v34 = vmax.f32 %v246_v29, 0.0  ;;  %v849_v35 = vmax.f32 %v671_v30, 0.0  ;;  %v261_v36 = vadd.f32 %v2201_v31, %v3073_v20 }
  0xd1   :  { %v686_v37 = vadd.f32 %v2263_v32, %v3073_v20  ;;  %v255_v38 = vpop.f32.mrf.mxu0  ;;  %v680_v39 = vpop.f32.mrf.mxu1 }
  0xd2   :  { %v3083_v40 = vmax.f32 %v424_v34, %v849_v35  ;;  %v427_v41 = vmax.f32 %v261_v36, 0.0  ;;  %v256_v42 = vadd.f32 %v3073_v20, %v255_v38  ;;  %v681_v43 = vadd.f32 %v3073_v20, %v680_v39 }
  0xd3   :  { %v852_v44 = vmax.f32 %v686_v37, 0.0  ;;  %v2204_v45 = vpop.f32.mrf.mxu0  ;;  %v2266_v46 = vpop.f32.mrf.mxu1 }
  0xd4   :  { %v426_v47 = vmax.f32 %v256_v42, 0.0  ;;  %v851_v48 = vmax.f32 %v681_v43, 0.0  ;;  %v271_v49 = vadd.f32 %v2204_v45, %v3073_v20  ;;  %v696_v50 = vadd.f32 %v2266_v46, %v3073_v20 }
  0xd5   :  { %v3089_v51 = vmax.f32 %v427_v41, %v852_v44  ;;  %v265_v52 = vpop.f32.mrf.mxu0  ;;  %v690_v53 = vpop.f32.mrf.mxu1 }
  0xd6   :  { %v3091_v54 = vmax.f32 %v426_v47, %v851_v48  ;;  %v429_v55 = vmax.f32 %v271_v49, 0.0  ;;  %v854_v56 = vmax.f32 %v696_v50, 0.0  ;;  %v266_v57 = vadd.f32 %v3073_v20, %v265_v52 }
  0xd7   :  { %v691_v58 = vadd.f32 %v3073_v20, %v690_v53  ;;  %v2207_v59 = vpop.f32.mrf.mxu0  ;;  %v2269_v60 = vpop.f32.mrf.mxu1 }
  0xd8   :  { %v3095_v61 = vmax.f32 %v429_v55, %v854_v56  ;;  %v428_v62 = vmax.f32 %v266_v57, 0.0  ;;  %v281_v63 = vadd.f32 %v2207_v59, %v3073_v20  ;;  %v706_v0 = vadd.f32 %v2269_v60, %v3073_v20 }
  0xd9   :  { %v853_v1 = vmax.f32 %v691_v58, 0.0  ;;  %v275_v2 = vpop.f32.mrf.mxu0  ;;  %v700_v3 = vpop.f32.mrf.mxu1 }
  0xda   :  { %v431_v4 = vmax.f32 %v281_v63, 0.0  ;;  %v856_v5 = vmax.f32 %v706_v0, 0.0  ;;  %v276_v6 = vadd.f32 %v3073_v20, %v275_v2  ;;  %v701_v7 = vadd.f32 %v3073_v20, %v700_v3 }
  0xdb   :  { %v3101_v8 = vmax.f32 %v428_v62, %v853_v1  ;;  %v2210_v9 = vpop.f32.mrf.mxu0  ;;  %v2272_v10 = vpop.f32.mrf.mxu1 }
  0xdc   :  { %v3103_v11 = vmax.f32 %v431_v4, %v856_v5  ;;  %v430_v12 = vmax.f32 %v276_v6, 0.0  ;;  %v855_v13 = vmax.f32 %v701_v7, 0.0  ;;  %v291_v14 = vadd.f32 %v2210_v9, %v3073_v20 }
  0xdd   :  { %v716_v15 = vadd.f32 %v2272_v10, %v3073_v20  ;;  %v285_v16 = vpop.f32.mrf.mxu0  ;;  %v710_v17 = vpop.f32.mrf.mxu1 }
  0xde   :  { %v3107_v18 = vmax.f32 %v430_v12, %v855_v13  ;;  %v433_v19 = vmax.f32 %v291_v14, 0.0  ;;  %v286_v21 = vadd.f32 %v3073_v20, %v285_v16  ;;  %v711_v22 = vadd.f32 %v3073_v20, %v710_v17 }
  0xdf   :  { %v858_v23 = vmax.f32 %v716_v15, 0.0  ;;  %v2213_v24 = vpop.f32.mrf.mxu0  ;;  %v2275_v25 = vpop.f32.mrf.mxu1 }
  0xe0   :  { %v432_v26 = vmax.f32 %v286_v21, 0.0  ;;  %v857_v27 = vmax.f32 %v711_v22, 0.0  ;;  %v301_v28 = vadd.f32 %v2213_v24, %v3073_v20  ;;  %v726_v29 = vadd.f32 %v2275_v25, %v3073_v20 }
  0xe1   :  { %v3113_v30 = vmax.f32 %v433_v19, %v858_v23  ;;  %v295_v31 = vpop.f32.mrf.mxu0  ;;  %v720_v32 = vpop.f32.mrf.mxu1 }
  0xe2   :  { %v3115_v34 = vmax.f32 %v432_v26, %v857_v27  ;;  %v435_v35 = vmax.f32 %v301_v28, 0.0  ;;  %v860_v36 = vmax.f32 %v726_v29, 0.0  ;;  %v296_v37 = vadd.f32 %v3073_v20, %v295_v31 }
  0xe3   :  { %v721_v38 = vadd.f32 %v3073_v20, %v720_v32  ;;  %v2216_v39 = vpop.f32.mrf.mxu0  ;;  %v2278_v41 = vpop.f32.mrf.mxu1 }
  0xe4   :  { %v3119_v42 = vmax.f32 %v435_v35, %v860_v36  ;;  %v434_v43 = vmax.f32 %v296_v37, 0.0  ;;  %v311_v44 = vadd.f32 %v2216_v39, %v3073_v20  ;;  %v736_v45 = vadd.f32 %v2278_v41, %v3073_v20 }
  0xe5   :  { %v859_v46 = vmax.f32 %v721_v38, 0.0  ;;  %v305_v47 = vpop.f32.mrf.mxu0  ;;  %v730_v48 = vpop.f32.mrf.mxu1 }
  0xe6   :  { %v437_v49 = vmax.f32 %v311_v44, 0.0  ;;  %v862_v50 = vmax.f32 %v736_v45, 0.0  ;;  %v306_v52 = vadd.f32 %v3073_v20, %v305_v47  ;;  %v731_v53 = vadd.f32 %v3073_v20, %v730_v48 }
  0xe7   :  { %v3125_v55 = vmax.f32 %v434_v43, %v859_v46  ;;  %v2219_v56 = vpop.f32.mrf.mxu0  ;;  %v2281_v57 = vpop.f32.mrf.mxu1 }
  0xe8   :  { %v3127_v58 = vmax.f32 %v437_v49, %v862_v50  ;;  %v436_v59 = vmax.f32 %v306_v52, 0.0  ;;  %v861_v60 = vmax.f32 %v731_v53, 0.0  ;;  %v321_v62 = vadd.f32 %v2219_v56, %v3073_v20 }
  0xe9   :  { %v746_v63 = vadd.f32 %v2281_v57, %v3073_v20  ;;  %v315_v0 = vpop.f32.mrf.mxu0  ;;  %v740_v1 = vpop.f32.mrf.mxu1 }
  0xea   :  { %v3131_v2 = vmax.f32 %v436_v59, %v861_v60  ;;  %v439_v3 = vmax.f32 %v321_v62, 0.0  ;;  %v316_v4 = vadd.f32 %v3073_v20, %v315_v0  ;;  %v741_v5 = vadd.f32 %v3073_v20, %v740_v1 }
  0xeb   :  { %v864_v6 = vmax.f32 %v746_v63, 0.0  ;;  %v2222_v7 = vpop.f32.mrf.mxu0  ;;  %v2284_v9 = vpop.f32.mrf.mxu1 }
  0xec   :  { %v438_v10 = vmax.f32 %v316_v4, 0.0  ;;  %v863_v12 = vmax.f32 %v741_v5, 0.0  ;;  %v331_v13 = vadd.f32 %v2222_v7, %v3073_v20  ;;  %v756_v14 = vadd.f32 %v2284_v9, %v3073_v20 }
  0xed   :  { %v3137_v15 = vmax.f32 %v439_v3, %v864_v6  ;;  %v325_v16 = vpop.f32.mrf.mxu0  ;;  %v750_v17 = vpop.f32.mrf.mxu1 }
  0xee   :  { %v3139_v19 = vmax.f32 %v438_v10, %v863_v12  ;;  %v441_v21 = vmax.f32 %v331_v13, 0.0  ;;  %v866_v22 = vmax.f32 %v756_v14, 0.0  ;;  %v326_v23 = vadd.f32 %v3073_v20, %v325_v16 }
  0xef   :  { %v751_v24 = vadd.f32 %v3073_v20, %v750_v17  ;;  %v2225_v25 = vpop.f32.mrf.mxu0  ;;  %v2287_v26 = vpop.f32.mrf.mxu1 }
  0xf0   :  { %v3143_v27 = vmax.f32 %v441_v21, %v866_v22  ;;  %v440_v28 = vmax.f32 %v326_v23, 0.0  ;;  %v341_v29 = vadd.f32 %v2225_v25, %v3073_v20  ;;  %v766_v31 = vadd.f32 %v2287_v26, %v3073_v20 }
  0xf1   :  { %v865_v32 = vmax.f32 %v751_v24, 0.0  ;;  %v335_v35 = vpop.f32.mrf.mxu0  ;;  %v760_v36 = vpop.f32.mrf.mxu1 }
  0xf2   :  { %v443_v37 = vmax.f32 %v341_v29, 0.0  ;;  %v868_v38 = vmax.f32 %v766_v31, 0.0  ;;  %v336_v39 = vadd.f32 %v3073_v20, %v335_v35  ;;  %v761_v41 = vadd.f32 %v3073_v20, %v760_v36 }
  0xf3   :  { %v3149_v43 = vmax.f32 %v440_v28, %v865_v32  ;;  %v2228_v44 = vpop.f32.mrf.mxu0  ;;  %v2290_v45 = vpop.f32.mrf.mxu1 }
  0xf4   :  { %v3151_v46 = vmax.f32 %v443_v37, %v868_v38  ;;  %v442_v47 = vmax.f32 %v336_v39, 0.0  ;;  %v867_v48 = vmax.f32 %v761_v41, 0.0  ;;  %v351_v49 = vadd.f32 %v2228_v44, %v3073_v20 }
  0xf5   :  { %v776_v50 = vadd.f32 %v2290_v45, %v3073_v20  ;;  %v345_v52 = vpop.f32.mrf.mxu0  ;;  %v770_v53 = vpop.f32.mrf.mxu1 }
  0xf6   :  { %v3155_v56 = vmax.f32 %v442_v47, %v867_v48  ;;  %v445_v57 = vmax.f32 %v351_v49, 0.0  ;;  %v346_v59 = vadd.f32 %v3073_v20, %v345_v52  ;;  %v771_v60 = vadd.f32 %v3073_v20, %v770_v53 }
  0xf7   :  { %v870_v62 = vmax.f32 %v776_v50, 0.0  ;;  %v2231_v63 = vpop.f32.mrf.mxu0  ;;  %v2293_v0 = vpop.f32.mrf.mxu1 }
  0xf8   :  { %v444_v1 = vmax.f32 %v346_v59, 0.0  ;;  %v869_v3 = vmax.f32 %v771_v60, 0.0  ;;  %v361_v4 = vadd.f32 %v2231_v63, %v3073_v20  ;;  %v786_v5 = vadd.f32 %v2293_v0, %v3073_v20 }
  0xf9   :  { %v3161_v6 = vmax.f32 %v445_v57, %v870_v62  ;;  %v355_v7 = vpop.f32.mrf.mxu0  ;;  %v780_v9 = vpop.f32.mrf.mxu1 }
  0xfa   :  { %v3163_v10 = vmax.f32 %v444_v1, %v869_v3  ;;  %v447_v12 = vmax.f32 %v361_v4, 0.0  ;;  %v872_v13 = vmax.f32 %v786_v5, 0.0  ;;  %v356_v14 = vadd.f32 %v3073_v20, %v355_v7 }
  0xfb   :  { %v781_v16 = vadd.f32 %v3073_v20, %v780_v9  ;;  %v2234_v17 = vpop.f32.mrf.mxu0  ;;  %v2296_v21 = vpop.f32.mrf.mxu1 }
  0xfc   :  { %v3167_v22 = vmax.f32 %v447_v12, %v872_v13  ;;  %v446_v23 = vmax.f32 %v356_v14, 0.0  ;;  %v371_v24 = vadd.f32 %v2234_v17, %v3073_v20  ;;  %v796_v25 = vadd.f32 %v2296_v21, %v3073_v20 }
  0xfd   :  { %v871_v26 = vmax.f32 %v781_v16, 0.0  ;;  %v365_v28 = vpop.f32.mrf.mxu0  ;;  %v790_v29 = vpop.f32.mrf.mxu1 }
  0xfe   :  { %v449_v31 = vmax.f32 %v371_v24, 0.0  ;;  %v874_v32 = vmax.f32 %v796_v25, 0.0  ;;  %v366_v35 = vadd.f32 %v3073_v20, %v365_v28  ;;  %v791_v36 = vadd.f32 %v3073_v20, %v790_v29 }
  0xff   :  { %v3173_v37 = vmax.f32 %v446_v23, %v871_v26  ;;  %v2237_v38 = vpop.f32.mrf.mxu0  ;;  %v2299_v39 = vpop.f32.mrf.mxu1 }
 0x100   :  { %v3175_v41 = vmax.f32 %v449_v31, %v874_v32  ;;  %v448_v44 = vmax.f32 %v366_v35, 0.0  ;;  %v873_v45 = vmax.f32 %v791_v36, 0.0  ;;  %v381_v47 = vadd.f32 %v2237_v38, %v3073_v20 }
 0x101   :  { %v806_v48 = vadd.f32 %v2299_v39, %v3073_v20  ;;  %v375_v49 = vpop.f32.mrf.mxu0  ;;  %v800_v50 = vpop.f32.mrf.mxu1 }
 0x102   :  { %v3179_v52 = vmax.f32 %v448_v44, %v873_v45  ;;  %v451_v53 = vmax.f32 %v381_v47, 0.0  ;;  %v376_v57 = vadd.f32 %v3073_v20, %v375_v49  ;;  %v801_v59 = vadd.f32 %v3073_v20, %v800_v50 }
 0x103   :  { %v876_v60 = vmax.f32 %v806_v48, 0.0  ;;  %v2240_v62 = vpop.f32.mrf.mxu0  ;;  %v2302_v63 = vpop.f32.mrf.mxu1 }
 0x104   :  { %v450_v0 = vmax.f32 %v376_v57, 0.0  ;;  %v875_v1 = vmax.f32 %v801_v59, 0.0  ;;  %v391_v3 = vadd.f32 %v2240_v62, %v3073_v20  ;;  %v816_v4 = vadd.f32 %v2302_v63, %v3073_v20 }
 0x105   :  { %v3185_v5 = vmax.f32 %v451_v53, %v876_v60  ;;  %v385_v7 = vpop.f32.mrf.mxu0  ;;  %v810_v9 = vpop.f32.mrf.mxu1 }
 0x106   :  { %v3187_v12 = vmax.f32 %v450_v0, %v875_v1  ;;  %v453_v13 = vmax.f32 %v391_v3, 0.0  ;;  %v878_v14 = vmax.f32 %v816_v4, 0.0  ;;  %v386_v16 = vadd.f32 %v3073_v20, %v385_v7 }
 0x107   :  { %v811_v17 = vadd.f32 %v3073_v20, %v810_v9  ;;  %v2243_v21 = vpop.f32.mrf.mxu0  ;;  %v2305_v23 = vpop.f32.mrf.mxu1 }
 0x108   :  { %v3191_v24 = vmax.f32 %v453_v13, %v878_v14  ;;  %v452_v25 = vmax.f32 %v386_v16, 0.0  ;;  %v401_v26 = vadd.f32 %v2243_v21, %v3073_v20  ;;  %v826_v28 = vadd.f32 %v2305_v23, %v3073_v20 }
 0x109   :  { %v877_v29 = vmax.f32 %v811_v17, 0.0  ;;  %v395_v31 = vpop.f32.mrf.mxu0  ;;  %v820_v32 = vpop.f32.mrf.mxu1 }
 0x10a   :  { %v455_v35 = vmax.f32 %v401_v26, 0.0  ;;  %v880_v36 = vmax.f32 %v826_v28, 0.0  ;;  %v396_v38 = vadd.f32 %v3073_v20, %v395_v31  ;;  %v821_v39 = vadd.f32 %v3073_v20, %v820_v32 }
 0x10b   :  { %v3197_v44 = vmax.f32 %v452_v25, %v877_v29  ;;  %v2246_v45 = vpop.f32.mrf.mxu0  ;;  %v2308_v47 = vpop.f32.mrf.mxu1 }
 0x10c   :  { %v3199_v48 = vmax.f32 %v455_v35, %v880_v36  ;;  %v454_v49 = vmax.f32 %v396_v38, 0.0  ;;  %v879_v50 = vmax.f32 %v821_v39, 0.0  ;;  %v411_v53 = vadd.f32 %v2246_v45, %v3073_v20 }
 0x10d   :  { %v836_v57 = vadd.f32 %v2308_v47, %v3073_v20  ;;  %v405_v59 = vpop.f32.mrf.mxu0  ;;  %v830_v60 = vpop.f32.mrf.mxu1 }
 0x10e   :  { %v3203_v62 = vmax.f32 %v454_v49, %v879_v50  ;;  %v457_v63 = vmax.f32 %v411_v53, 0.0  ;;  %v406_v0 = vadd.f32 %v3073_v20, %v405_v59  ;;  %v831_v1 = vadd.f32 %v3073_v20, %v830_v60 }
 0x10f   :  { %v882_v3 = vmax.f32 %v836_v57, 0.0  ;;  %v2249_v4 = vpop.f32.mrf.mxu0  ;;  %v2311_v7 = vpop.f32.mrf.mxu1 }
 0x110   :  { %v456_v9 = vmax.f32 %v406_v0, 0.0  ;;  %v881_v13 = vmax.f32 %v831_v1, 0.0  ;;  %v421_v14 = vadd.f32 %v2249_v4, %v3073_v20  ;;  %v846_v16 = vadd.f32 %v2311_v7, %v3073_v20 }
 0x111   :  { %v3209_v17 = vmax.f32 %v457_v63, %v882_v3  ;;  %v415_v21 = vpop.f32.mrf.mxu0  ;;  %v840_v23 = vpop.f32.mrf.mxu1 }
 0x112   :  { %v3211_v25 = vmax.f32 %v456_v9, %v881_v13  ;;  %v459_v26 = vmax.f32 %v421_v14, 0.0  ;;  %v884_v28 = vmax.f32 %v846_v16, 0.0  ;;  %v416_v29 = vadd.f32 %v3073_v20, %v415_v21 }
 0x113   :  { %v841_v31 = vadd.f32 %v3073_v20, %v840_v23  ;;  %v2322_v32 = vpop.f32.mrf.mxu0  ;;  %v2384_v35 = vpop.f32.mrf.mxu1 }
 0x114   :  { %v3215_v36 = vmax.f32 %v459_v26, %v884_v28  ;;  %v458_v38 = vmax.f32 %v416_v29, 0.0  ;;  %v1137_v39 = vadd.f32 %v2322_v32, %v3073_v20  ;;  %v1562_v45 = vadd.f32 %v2384_v35, %v3073_v20 }
 0x115   :  { %v883_v47 = vmax.f32 %v841_v31, 0.0  ;;  %v1131_v49 = vpop.f32.mrf.mxu0  ;;  %v1556_v50 = vpop.f32.mrf.mxu1 }
 0x116   :  { %v1311_v53 = vmax.f32 %v1137_v39, 0.0  ;;  %v1736_v57 = vmax.f32 %v1562_v45, 0.0  ;;  %v1132_v59 = vadd.f32 %v3073_v20, %v1131_v49  ;;  %v1557_v60 = vadd.f32 %v3073_v20, %v1556_v50 }
 0x117   :  { %v3221_v63 = vmax.f32 %v458_v38, %v883_v47  ;;  %v2325_v0 = vpop.f32.mrf.mxu0  ;;  %v2387_v1 = vpop.f32.mrf.mxu1 }
 0x118   :  { %v1772_v3 = vmax.f32 %v1311_v53, %v1736_v57  ;;  %v1310_v4 = vmax.f32 %v1132_v59, 0.0  ;;  %v1735_v7 = vmax.f32 %v1557_v60, 0.0  ;;  %v1147_v9 = vadd.f32 %v2325_v0, %v3073_v20 }
 0x119   :  { %v1572_v13 = vadd.f32 %v2387_v1, %v3073_v20  ;;  %v1141_v14 = vpop.f32.mrf.mxu0  ;;  %v1566_v16 = vpop.f32.mrf.mxu1 }
 0x11a   :  { %v1808_v21 = vmax.f32 %v3079_v33, %v1772_v3  ;;  %v1771_v23 = vmax.f32 %v1310_v4, %v1735_v7  ;;  %v1313_v26 = vmax.f32 %v1147_v9, 0.0  ;;  %v1142_v28 = vadd.f32 %v3073_v20, %v1141_v14 }
 0x11b   :  { %v1738_v29 = vmax.f32 %v1572_v13, 0.0  ;;  %v1567_v31 = vadd.f32 %v3073_v20, %v1566_v16  ;;  %v2328_v32 = vpop.f32.mrf.mxu0  ;;  %v2390_v35 = vpop.f32.mrf.mxu1 }
 0x11c   :  { %1844 = vst [vmem:[%s3432_s6 + $0x8] sm:$0xff] %v1808_v21  ;;  %v1807_v38 = vmax.f32 %v3083_v40, %v1771_v23  ;;  %v1312_v39 = vmax.f32 %v1142_v28, 0.0  ;;  %v1157_v45 = vadd.f32 %v2328_v32, %v3073_v20  ;;  %v1582_v33 = vadd.f32 %v2390_v35, %v3073_v20 }
 0x11d   :  { %v1774_v47 = vmax.f32 %v1313_v26, %v1738_v29  ;;  %v1737_v49 = vmax.f32 %v1567_v31, 0.0  ;;  %v1151_v50 = vpop.f32.mrf.mxu0  ;;  %v1576_v53 = vpop.f32.mrf.mxu1 }
 0x11e   :  { %1843 = vst [vmem:[%s3432_s6] sm:$0xff] %v1807_v38  ;;  %v1315_v57 = vmax.f32 %v1157_v45, 0.0  ;;  %v1740_v59 = vmax.f32 %v1582_v33, 0.0  ;;  %v1152_v60 = vadd.f32 %v3073_v20, %v1151_v50  ;;  %v1577_v0 = vadd.f32 %v3073_v20, %v1576_v53 }
 0x11f   :  { %v1810_v40 = vmax.f32 %v3089_v51, %v1774_v47  ;;  %v1773_v1 = vmax.f32 %v1312_v39, %v1737_v49  ;;  %v2331_v3 = vpop.f32.mrf.mxu0  ;;  %v2393_v4 = vpop.f32.mrf.mxu1 }
 0x120   :  { %v1776_v7 = vmax.f32 %v1315_v57, %v1740_v59  ;;  %v1314_v9 = vmax.f32 %v1152_v60, 0.0  ;;  %v1739_v13 = vmax.f32 %v1577_v0, 0.0  ;;  %v1167_v14 = vadd.f32 %v2331_v3, %v3073_v20 }
 0x121   :  { %1846 = vst [vmem:[%s3432_s6 + $0x18] sm:$0xff] %v1810_v40  ;;  %v1809_v16 = vmax.f32 %v3091_v54, %v1773_v1  ;;  %v1592_v21 = vadd.f32 %v2393_v4, %v3073_v20  ;;  %v1161_v23 = vpop.f32.mrf.mxu0  ;;  %v1586_v26 = vpop.f32.mrf.mxu1 }
 0x122   :  { %v1812_v51 = vmax.f32 %v3095_v61, %v1776_v7  ;;  %v1775_v28 = vmax.f32 %v1314_v9, %v1739_v13  ;;  %v1317_v29 = vmax.f32 %v1167_v14, 0.0  ;;  %v1162_v31 = vadd.f32 %v3073_v20, %v1161_v23 }
 0x123   :  { %1845 = vst [vmem:[%s3432_s6 + $0x10] sm:$0xff] %v1809_v16  ;;  %v1742_v32 = vmax.f32 %v1592_v21, 0.0  ;;  %v1587_v35 = vadd.f32 %v3073_v20, %v1586_v26  ;;  %v2334_v38 = vpop.f32.mrf.mxu0  ;;  %v2396_v39 = vpop.f32.mrf.mxu1 }
 0x124   :  { %1848 = vst [vmem:[%s3432_s6 + $0x28] sm:$0xff] %v1812_v51  ;;  %v1811_v54 = vmax.f32 %v3101_v8, %v1775_v28  ;;  %v1316_v61 = vmax.f32 %v1162_v31, 0.0  ;;  %v1177_v45 = vadd.f32 %v2334_v38, %v3073_v20  ;;  %v1602_v33 = vadd.f32 %v2396_v39, %v3073_v20 }
 0x125   :  { %v1778_v47 = vmax.f32 %v1317_v29, %v1742_v32  ;;  %v1741_v49 = vmax.f32 %v1587_v35, 0.0  ;;  %v1171_v50 = vpop.f32.mrf.mxu0  ;;  %v1596_v53 = vpop.f32.mrf.mxu1 }
 0x126   :  { %1847 = vst [vmem:[%s3432_s6 + $0x20] sm:$0xff] %v1811_v54  ;;  %v1319_v57 = vmax.f32 %v1177_v45, 0.0  ;;  %v1744_v59 = vmax.f32 %v1602_v33, 0.0  ;;  %v1172_v60 = vadd.f32 %v3073_v20, %v1171_v50  ;;  %v1597_v0 = vadd.f32 %v3073_v20, %v1596_v53 }
 0x127   :  { %v1814_v8 = vmax.f32 %v3103_v11, %v1778_v47  ;;  %v1777_v40 = vmax.f32 %v1316_v61, %v1741_v49  ;;  %v2337_v1 = vpop.f32.mrf.mxu0  ;;  %v2399_v3 = vpop.f32.mrf.mxu1 }
 0x128   :  { %v1780_v4 = vmax.f32 %v1319_v57, %v1744_v59  ;;  %v1318_v7 = vmax.f32 %v1172_v60, 0.0  ;;  %v1743_v9 = vmax.f32 %v1597_v0, 0.0  ;;  %v1187_v13 = vadd.f32 %v2337_v1, %v3073_v20 }
 0x129   :  { %1850 = vst [vmem:[%s3432_s6 + $0x38] sm:$0xff] %v1814_v8  ;;  %v1813_v14 = vmax.f32 %v3107_v18, %v1777_v40  ;;  %v1612_v16 = vadd.f32 %v2399_v3, %v3073_v20  ;;  %v1181_v21 = vpop.f32.mrf.mxu0  ;;  %v1606_v23 = vpop.f32.mrf.mxu1 }
 0x12a   :  { %v1816_v11 = vmax.f32 %v3113_v30, %v1780_v4  ;;  %v1779_v26 = vmax.f32 %v1318_v7, %v1743_v9  ;;  %v1321_v51 = vmax.f32 %v1187_v13, 0.0  ;;  %v1182_v28 = vadd.f32 %v3073_v20, %v1181_v21 }
 0x12b   :  { %1849 = vst [vmem:[%s3432_s6 + $0x30] sm:$0xff] %v1813_v14  ;;  %v1746_v29 = vmax.f32 %v1612_v16, 0.0  ;;  %v1607_v31 = vadd.f32 %v3073_v20, %v1606_v23  ;;  %v2340_v32 = vpop.f32.mrf.mxu0  ;;  %v2402_v35 = vpop.f32.mrf.mxu1 }
 0x12c   :  { %1852 = vst [vmem:[%s3432_s6 + $0x48] sm:$0xff] %v1816_v11  ;;  %v1815_v18 = vmax.f32 %v3115_v34, %v1779_v26  ;;  %v1320_v30 = vmax.f32 %v1182_v28, 0.0  ;;  %v1197_v38 = vadd.f32 %v2340_v32, %v3073_v20  ;;  %v1622_v39 = vadd.f32 %v2402_v35, %v3073_v20 }
 0x12d   :  { %v1782_v54 = vmax.f32 %v1321_v51, %v1746_v29  ;;  %v1745_v61 = vmax.f32 %v1607_v31, 0.0  ;;  %v1191_v45 = vpop.f32.mrf.mxu0  ;;  %v1616_v33 = vpop.f32.mrf.mxu1 }
 0x12e   :  { %1851 = vst [vmem:[%s3432_s6 + $0x40] sm:$0xff] %v1815_v18  ;;  %v1323_v47 = vmax.f32 %v1197_v38, 0.0  ;;  %v1748_v49 = vmax.f32 %v1622_v39, 0.0  ;;  %v1192_v50 = vadd.f32 %v3073_v20, %v1191_v45  ;;  %v1617_v53 = vadd.f32 %v3073_v20, %v1616_v33 }
 0x12f   :  { %v1818_v34 = vmax.f32 %v3119_v42, %v1782_v54  ;;  %v1781_v57 = vmax.f32 %v1320_v30, %v1745_v61  ;;  %v2343_v59 = vpop.f32.mrf.mxu0  ;;  %v2405_v60 = vpop.f32.mrf.mxu1 }
 0x130   :  { %v1784_v0 = vmax.f32 %v1323_v47, %v1748_v49  ;;  %v1322_v8 = vmax.f32 %v1192_v50, 0.0  ;;  %v1747_v40 = vmax.f32 %v1617_v53, 0.0  ;;  %v1207_v1 = vadd.f32 %v2343_v59, %v3073_v20 }
 0x131   :  { %1854 = vst [vmem:[%s3432_s6 + $0x58] sm:$0xff] %v1818_v34  ;;  %v1817_v3 = vmax.f32 %v3125_v55, %v1781_v57  ;;  %v1632_v4 = vadd.f32 %v2405_v60, %v3073_v20  ;;  %v1201_v7 = vpop.f32.mrf.mxu0  ;;  %v1626_v9 = vpop.f32.mrf.mxu1 }
 0x132   :  { %v1820_v42 = vmax.f32 %v3127_v58, %v1784_v0  ;;  %v1783_v13 = vmax.f32 %v1322_v8, %v1747_v40  ;;  %v1325_v14 = vmax.f32 %v1207_v1, 0.0  ;;  %v1202_v16 = vadd.f32 %v3073_v20, %v1201_v7 }
 0x133   :  { %1853 = vst [vmem:[%s3432_s6 + $0x50] sm:$0xff] %v1817_v3  ;;  %v1750_v21 = vmax.f32 %v1632_v4, 0.0  ;;  %v1627_v23 = vadd.f32 %v3073_v20, %v1626_v9  ;;  %v2346_v11 = vpop.f32.mrf.mxu0  ;;  %v2408_v26 = vpop.f32.mrf.mxu1 }
 0x134   :  { %1856 = vst [vmem:[%s3432_s6 + $0x68] sm:$0xff] %v1820_v42  ;;  %v1819_v55 = vmax.f32 %v3131_v2, %v1783_v13  ;;  %v1324_v58 = vmax.f32 %v1202_v16, 0.0  ;;  %v1217_v51 = vadd.f32 %v2346_v11, %v3073_v20  ;;  %v1642_v28 = vadd.f32 %v2408_v26, %v3073_v20 }
 0x135   :  { %v1786_v29 = vmax.f32 %v1325_v14, %v1750_v21  ;;  %v1749_v31 = vmax.f32 %v1627_v23, 0.0  ;;  %v1211_v32 = vpop.f32.mrf.mxu0  ;;  %v1636_v35 = vpop.f32.mrf.mxu1 }
 0x136   :  { %1855 = vst [vmem:[%s3432_s6 + $0x60] sm:$0xff] %v1819_v55  ;;  %v1327_v18 = vmax.f32 %v1217_v51, 0.0  ;;  %v1752_v30 = vmax.f32 %v1642_v28, 0.0  ;;  %v1212_v38 = vadd.f32 %v3073_v20, %v1211_v32  ;;  %v1637_v39 = vadd.f32 %v3073_v20, %v1636_v35 }
 0x137   :  { %v1822_v2 = vmax.f32 %v3137_v15, %v1786_v29  ;;  %v1785_v54 = vmax.f32 %v1324_v58, %v1749_v31  ;;  %v2349_v61 = vpop.f32.mrf.mxu0  ;;  %v2411_v45 = vpop.f32.mrf.mxu1 }
 0x138   :  { %v1788_v33 = vmax.f32 %v1327_v18, %v1752_v30  ;;  %v1326_v47 = vmax.f32 %v1212_v38, 0.0  ;;  %v1751_v49 = vmax.f32 %v1637_v39, 0.0  ;;  %v1227_v50 = vadd.f32 %v2349_v61, %v3073_v20 }
 0x139   :  { %1858 = vst [vmem:[%s3432_s6 + $0x78] sm:$0xff] %v1822_v2  ;;  %v1821_v53 = vmax.f32 %v3139_v19, %v1785_v54  ;;  %v1652_v34 = vadd.f32 %v2411_v45, %v3073_v20  ;;  %v1221_v57 = vpop.f32.mrf.mxu0  ;;  %v1646_v59 = vpop.f32.mrf.mxu1 }
 0x13a   :  { %v1824_v15 = vmax.f32 %v3143_v27, %v1788_v33  ;;  %v1787_v60 = vmax.f32 %v1326_v47, %v1751_v49  ;;  %v1329_v0 = vmax.f32 %v1227_v50, 0.0  ;;  %v1222_v8 = vadd.f32 %v3073_v20, %v1221_v57 }
 0x13b   :  { %1857 = vst [vmem:[%s3432_s6 + $0x70] sm:$0xff] %v1821_v53  ;;  %v1754_v40 = vmax.f32 %v1652_v34, 0.0  ;;  %v1647_v1 = vadd.f32 %v3073_v20, %v1646_v59  ;;  %v2352_v3 = vpop.f32.mrf.mxu0  ;;  %v2414_v4 = vpop.f32.mrf.mxu1 }
 0x13c   :  { %1860 = vst [vmem:[%s3432_s6 + $0x88] sm:$0xff] %v1824_v15  ;;  %v1823_v19 = vmax.f32 %v3149_v43, %v1787_v60  ;;  %v1328_v27 = vmax.f32 %v1222_v8, 0.0  ;;  %v1237_v7 = vadd.f32 %v2352_v3, %v3073_v20  ;;  %v1662_v9 = vadd.f32 %v2414_v4, %v3073_v20 }
 0x13d   :  { %v1790_v42 = vmax.f32 %v1329_v0, %v1754_v40  ;;  %v1753_v13 = vmax.f32 %v1647_v1, 0.0  ;;  %v1231_v14 = vpop.f32.mrf.mxu0  ;;  %v1656_v16 = vpop.f32.mrf.mxu1 }
 0x13e   :  { %1859 = vst [vmem:[%s3432_s6 + $0x80] sm:$0xff] %v1823_v19  ;;  %v1331_v21 = vmax.f32 %v1237_v7, 0.0  ;;  %v1756_v23 = vmax.f32 %v1662_v9, 0.0  ;;  %v1232_v11 = vadd.f32 %v3073_v20, %v1231_v14  ;;  %v1657_v26 = vadd.f32 %v3073_v20, %v1656_v16 }
 0x13f   :  { %v1826_v43 = vmax.f32 %v3151_v46, %v1790_v42  ;;  %v1789_v55 = vmax.f32 %v1328_v27, %v1753_v13  ;;  %v2355_v58 = vpop.f32.mrf.mxu0  ;;  %v2417_v51 = vpop.f32.mrf.mxu1 }
 0x140   :  { %v1792_v28 = vmax.f32 %v1331_v21, %v1756_v23  ;;  %v1330_v29 = vmax.f32 %v1232_v11, 0.0  ;;  %v1755_v31 = vmax.f32 %v1657_v26, 0.0  ;;  %v1247_v32 = vadd.f32 %v2355_v58, %v3073_v20 }
 0x141   :  { %1862 = vst [vmem:[%s3432_s6 + $0x98] sm:$0xff] %v1826_v43  ;;  %v1825_v35 = vmax.f32 %v3155_v56, %v1789_v55  ;;  %v1672_v18 = vadd.f32 %v2417_v51, %v3073_v20  ;;  %v1241_v30 = vpop.f32.mrf.mxu0  ;;  %v1666_v38 = vpop.f32.mrf.mxu1 }
 0x142   :  { %v1828_v46 = vmax.f32 %v3161_v6, %v1792_v28  ;;  %v1791_v39 = vmax.f32 %v1330_v29, %v1755_v31  ;;  %v1333_v2 = vmax.f32 %v1247_v32, 0.0  ;;  %v1242_v54 = vadd.f32 %v3073_v20, %v1241_v30 }
 0x143   :  { %1861 = vst [vmem:[%s3432_s6 + $0x90] sm:$0xff] %v1825_v35  ;;  %v1758_v61 = vmax.f32 %v1672_v18, 0.0  ;;  %v1667_v45 = vadd.f32 %v3073_v20, %v1666_v38  ;;  %v2358_v33 = vpop.f32.mrf.mxu0  ;;  %v2420_v47 = vpop.f32.mrf.mxu1 }
 0x144   :  { %1864 = vst [vmem:[%s3432_s6 + $0xa8] sm:$0xff] %v1828_v46  ;;  %v1827_v56 = vmax.f32 %v3163_v10, %v1791_v39  ;;  %v1332_v6 = vmax.f32 %v1242_v54, 0.0  ;;  %v1257_v49 = vadd.f32 %v2358_v33, %v3073_v20  ;;  %v1682_v50 = vadd.f32 %v2420_v47, %v3073_v20  ;;  %v2436_v33 = vld [vmem:[%s3431_s5] ss:$0 sm:$0xff] }
 0x145   :  { %v1794_v53 = vmax.f32 %v1333_v2, %v1758_v61  ;;  %v1757_v34 = vmax.f32 %v1667_v45, 0.0  ;;  %v1251_v57 = vpop.f32.mrf.mxu0  ;;  %v1676_v59 = vpop.f32.mrf.mxu1 }
 0x146   :  { %1863 = vst [vmem:[%s3432_s6 + $0xa0] sm:$0xff] %v1827_v56  ;;  %v1335_v15 = vmax.f32 %v1257_v49, 0.0  ;;  %v1760_v60 = vmax.f32 %v1682_v50, 0.0  ;;  %v1252_v0 = vadd.f32 %v3073_v20, %v1251_v57  ;;  %v1677_v8 = vadd.f32 %v3073_v20, %v1676_v59 }
 0x147   :  { %v1830_v10 = vmax.f32 %v3167_v22, %v1794_v53  ;;  %v1793_v40 = vmax.f32 %v1332_v6, %v1757_v34  ;;  %v2361_v1 = vpop.f32.mrf.mxu0  ;;  %v2423_v3 = vpop.f32.mrf.mxu1 }
 0x148   :  { %v1796_v4 = vmax.f32 %v1335_v15, %v1760_v60  ;;  %v1334_v19 = vmax.f32 %v1252_v0, 0.0  ;;  %v1759_v27 = vmax.f32 %v1677_v8, 0.0  ;;  %v1267_v7 = vadd.f32 %v2361_v1, %v3073_v20 }
 0x149   :  { %1866 = vst [vmem:[%s3432_s6 + $0xb8] sm:$0xff] %v1830_v10  ;;  %v1829_v9 = vmax.f32 %v3173_v37, %v1793_v40  ;;  %v1692_v42 = vadd.f32 %v2423_v3, %v3073_v20  ;;  %v1261_v13 = vpop.f32.mrf.mxu0  ;;  %v1686_v14 = vpop.f32.mrf.mxu1 }
 0x14a   :  { %v1832_v22 = vmax.f32 %v3175_v41, %v1796_v4  ;;  %v1795_v16 = vmax.f32 %v1334_v19, %v1759_v27  ;;  %v1337_v21 = vmax.f32 %v1267_v7, 0.0  ;;  %v1262_v23 = vadd.f32 %v3073_v20, %v1261_v13 }
 0x14b   :  { %1865 = vst [vmem:[%s3432_s6 + $0xb0] sm:$0xff] %v1829_v9  ;;  %v1762_v11 = vmax.f32 %v1692_v42, 0.0  ;;  %v1687_v26 = vadd.f32 %v3073_v20, %v1686_v14  ;;  %v2364_v43 = vpop.f32.mrf.mxu0  ;;  %v2426_v55 = vpop.f32.mrf.mxu1 }
 0x14c   :  { %1868 = vst [vmem:[%s3432_s6 + $0xc8] sm:$0xff] %v1832_v22  ;;  %v1831_v37 = vmax.f32 %v3179_v52, %v1795_v16  ;;  %v1336_v41 = vmax.f32 %v1262_v23, 0.0  ;;  %v1277_v58 = vadd.f32 %v2364_v43, %v3073_v20  ;;  %v1702_v51 = vadd.f32 %v2426_v55, %v3073_v20 }
 0x14d   :  { %v1798_v28 = vmax.f32 %v1337_v21, %v1762_v11  ;;  %v1761_v29 = vmax.f32 %v1687_v26, 0.0  ;;  %v1271_v31 = vpop.f32.mrf.mxu0  ;;  %v1696_v32 = vpop.f32.mrf.mxu1 }
 0x14e   :  { %1867 = vst [vmem:[%s3432_s6 + $0xc0] sm:$0xff] %v1831_v37  ;;  %v1339_v35 = vmax.f32 %v1277_v58, 0.0  ;;  %v1764_v18 = vmax.f32 %v1702_v51, 0.0  ;;  %v1272_v30 = vadd.f32 %v3073_v20, %v1271_v31  ;;  %v1697_v38 = vadd.f32 %v3073_v20, %v1696_v32 }
 0x14f   :  { %v1834_v52 = vmax.f32 %v3185_v5, %v1798_v28  ;;  %v1797_v46 = vmax.f32 %v1336_v41, %v1761_v29  ;;  %v2367_v39 = vpop.f32.mrf.mxu0  ;;  %v2429_v2 = vpop.f32.mrf.mxu1 }
 0x150   :  { %v1800_v54 = vmax.f32 %v1339_v35, %v1764_v18  ;;  %v1338_v61 = vmax.f32 %v1272_v30, 0.0  ;;  %v1763_v45 = vmax.f32 %v1697_v38, 0.0  ;;  %v1287_v47 = vadd.f32 %v2436_v33, %v2367_v39 }
 0x151   :  { %1870 = vst [vmem:[%s3432_s6 + $0xd8] sm:$0xff] %v1834_v52  ;;  %v1833_v56 = vmax.f32 %v3187_v12, %v1797_v46  ;;  %v1712_v20 = vadd.f32 %v2436_v33, %v2429_v2  ;;  %v1281_v6 = vpop.f32.mrf.mxu0  ;;  %v1706_v5 = vpop.f32.mrf.mxu1 }
 0x152   :  { %v1836_v49 = vmax.f32 %v3191_v24, %v1800_v54  ;;  %v1799_v50 = vmax.f32 %v1338_v61, %v1763_v45  ;;  %v1341_v53 = vmax.f32 %v1287_v47, 0.0  ;;  %v1282_v34 = vadd.f32 %v2436_v33, %v1281_v6 }
 0x153   :  { %1869 = vst [vmem:[%s3432_s6 + $0xd0] sm:$0xff] %v1833_v56  ;;  %v1766_v57 = vmax.f32 %v1712_v20, 0.0  ;;  %v1707_v59 = vadd.f32 %v2436_v33, %v1706_v5  ;;  %v2370_v15 = vpop.f32.mrf.mxu0  ;;  %v2432_v60 = vpop.f32.mrf.mxu1 }
 0x154   :  { %1872 = vst [vmem:[%s3432_s6 + $0xe8] sm:$0xff] %v1836_v49  ;;  %v1835_v12 = vmax.f32 %v3197_v44, %v1799_v50  ;;  %v1340_v0 = vmax.f32 %v1282_v34, 0.0  ;;  %v1297_v8 = vadd.f32 %v2436_v33, %v2370_v15  ;;  %v1722_v24 = vadd.f32 %v2436_v33, %v2432_v60 }
 0x155   :  { %v1802_v10 = vmax.f32 %v1341_v53, %v1766_v57  ;;  %v1765_v40 = vmax.f32 %v1707_v59, 0.0  ;;  %v1291_v1 = vpop.f32.mrf.mxu0  ;;  %v1716_v3 = vpop.f32.mrf.mxu1 }
 0x156   :  { %1871 = vst [vmem:[%s3432_s6 + $0xe0] sm:$0xff] %v1835_v12  ;;  %v1343_v4 = vmax.f32 %v1297_v8, 0.0  ;;  %v1768_v19 = vmax.f32 %v1722_v24, 0.0  ;;  %v1292_v27 = vadd.f32 %v2436_v33, %v1291_v1  ;;  %v1717_v7 = vadd.f32 %v2436_v33, %v1716_v3 }
 0x157   :  { %v1838_v9 = vmax.f32 %v3199_v48, %v1802_v10  ;;  %v1801_v42 = vmax.f32 %v1340_v0, %v1765_v40  ;;  %v2373_v13 = vpop.f32.mrf.mxu0  ;;  %v2435_v44 = vpop.f32.mrf.mxu1 }
 0x158   :  { %v1804_v14 = vmax.f32 %v1343_v4, %v1768_v19  ;;  %v1342_v22 = vmax.f32 %v1292_v27, 0.0  ;;  %v1767_v16 = vmax.f32 %v1717_v7, 0.0  ;;  %v1307_v21 = vadd.f32 %v2436_v33, %v2373_v13 }
 0x159   :  { %1874 = vst [vmem:[%s3432_s6 + $0xf8] sm:$0xff] %v1838_v9  ;;  %v1837_v23 = vmax.f32 %v3203_v62, %v1801_v42  ;;  %v1732_v11 = vadd.f32 %v2436_v33, %v2435_v44  ;;  %v1301_v26 = vpop.f32.mrf.mxu0  ;;  %v1726_v43 = vpop.f32.mrf.mxu1 }
 0x15a   :  { %v1840_v55 = vmax.f32 %v3209_v17, %v1804_v14  ;;  %v1803_v37 = vmax.f32 %v1342_v22, %v1767_v16  ;;  %v1345_v48 = vmax.f32 %v1307_v21, 0.0  ;;  %v1302_v41 = vadd.f32 %v2436_v33, %v1301_v26 }
 0x15b   :  { %1873 = vst [vmem:[%s3432_s6 + $0xf0] sm:$0xff] %v1837_v23  ;;  %v1770_v58 = vmax.f32 %v1732_v11, 0.0  ;;  %v1727_v51 = vadd.f32 %v2436_v33, %v1726_v43 }
 0x15c   :  { %1876 = vst [vmem:[%s3432_s6 + $0x108] sm:$0xff] %v1840_v55  ;;  %v1839_v62 = vmax.f32 %v3211_v25, %v1803_v37  ;;  %v1344_v28 = vmax.f32 %v1302_v41, 0.0 }
 0x15d   :  { %v1806_v29 = vmax.f32 %v1345_v48, %v1770_v58  ;;  %v1769_v31 = vmax.f32 %v1727_v51, 0.0 }
 0x15e   :  { %1875 = vst [vmem:[%s3432_s6 + $0x100] sm:$0xff] %v1839_v62 }
 0x15f   :  { %v1842_v17 = vmax.f32 %v3215_v36, %v1806_v29  ;;  %v1805_v32 = vmax.f32 %v1344_v28, %v1769_v31 }
 0x161   :  { %1878 = vst [vmem:[%s3432_s6 + $0x118] sm:$0xff] %v1842_v17  ;;  %v1841_v35 = vmax.f32 %v3221_v63, %v1805_v32 }
 0x163   :  { %1877 = vst [vmem:[%s3432_s6 + $0x110] sm:$0xff] %v1841_v35 }

// kernel: _lambda_.4
= control target key start
LH: loop header
LB: loop body
LE: loop exit
PB: predicated region body
PF: predicated region fallthrough
CT: control target
= control target key end

     0   :  { %s1099_s4 = inlined_call_operand.vmem [shape: f32[256,128], index: 4, kind: input, shape index: {}]   ;;  %s1100_s0 = inlined_call_operand.vmem [shape: f32[32,256], index: 0, kind: input, shape index: {}]   ;;  %s1101_s1 = inlined_call_operand.vmem [shape: f32[32,256], index: 1, kind: input, shape index: {}]   ;;  %s1102_s2 = inlined_call_operand.vmem [shape: f32[32,256], index: 2, kind: input, shape index: {}]   ;;  %s1103_s3 = inlined_call_operand.vmem [shape: f32[32,256], index: 3, kind: input, shape index: {}]   ;;  %s1104_s5 = inlined_call_operand.vmem [shape: f32[1,128], index: 5, kind: input, shape index: {}]   ;;  %s1105_s6 = inlined_call_operand.vmem [shape: f32[32,128], index: 6, kind: output, shape index: {}]  }
   0x1   :  { %v685_v0 = vld [vmem:[%s1099_s4 + $0xf8] sm:$0xff]  ;;  %v695_v2 = vld [vmem:[%s1099_s4 + $0xf0] sm:$0xff]  ;;  %v709_v4 = vld [vmem:[%s1099_s4 + $0xe8] sm:$0xff] }
   0x2   :  { %v690_v1 = vld [vmem:[%s1099_s4 + $0x78] sm:$0xff]  ;;  %471 = vmatprep.subr.mxu0 %v685_v0  ;;  %515 = vmatprep.subr.mxu1 %v685_v0  ;;  %v702_v3 = vld [vmem:[%s1099_s4 + $0x70] sm:$0xff]  ;;  %v716_v5 = vld [vmem:[%s1099_s4 + $0x68] sm:$0xff] }
   0x3   :  { %472 = vmatpush3.msra.mxu0 %v690_v1  ;;  %516 = vmatpush3.msra.mxu1 %v690_v1  ;;  %v723_v6 = vld [vmem:[%s1099_s4 + $0xe0] sm:$0xff]  ;;  %v737_v8 = vld [vmem:[%s1099_s4 + $0xd8] sm:$0xff]  ;;  %v751_v10 = vld [vmem:[%s1099_s4 + $0xd0] sm:$0xff] }
   0x4   :  { %473 = vmatprep.subr.mxu0 %v695_v2  ;;  %517 = vmatprep.subr.mxu1 %v695_v2  ;;  %v730_v7 = vld [vmem:[%s1099_s4 + $0x60] sm:$0xff]  ;;  %v744_v9 = vld [vmem:[%s1099_s4 + $0x58] sm:$0xff]  ;;  %v758_v11 = vld [vmem:[%s1099_s4 + $0x50] sm:$0xff] }
   0x5   :  { %474 = vmatpush3.msra.mxu0 %v702_v3  ;;  %518 = vmatpush3.msra.mxu1 %v702_v3  ;;  %v765_v12 = vld [vmem:[%s1099_s4 + $0xc8] sm:$0xff]  ;;  %v779_v14 = vld [vmem:[%s1099_s4 + $0xc0] sm:$0xff]  ;;  %v793_v16 = vld [vmem:[%s1099_s4 + $0xb8] sm:$0xff] }
   0x6   :  { %475 = vmatprep.subr.mxu0 %v709_v4  ;;  %519 = vmatprep.subr.mxu1 %v709_v4  ;;  %v772_v13 = vld [vmem:[%s1099_s4 + $0x48] sm:$0xff]  ;;  %v786_v15 = vld [vmem:[%s1099_s4 + $0x40] sm:$0xff]  ;;  %v800_v17 = vld [vmem:[%s1099_s4 + $0x38] sm:$0xff] }
   0x7   :  { %476 = vmatpush3.msra.mxu0 %v716_v5  ;;  %520 = vmatpush3.msra.mxu1 %v716_v5  ;;  %v807_v18 = vld [vmem:[%s1099_s4 + $0xb0] sm:$0xff]  ;;  %v821_v20 = vld [vmem:[%s1099_s4 + $0xa8] sm:$0xff]  ;;  %v835_v22 = vld [vmem:[%s1099_s4 + $0xa0] sm:$0xff] }
   0x8   :  { %477 = vmatprep.subr.mxu0 %v723_v6  ;;  %521 = vmatprep.subr.mxu1 %v723_v6  ;;  %v814_v19 = vld [vmem:[%s1099_s4 + $0x30] sm:$0xff]  ;;  %v828_v21 = vld [vmem:[%s1099_s4 + $0x28] sm:$0xff]  ;;  %v842_v23 = vld [vmem:[%s1099_s4 + $0x20] sm:$0xff] }
   0x9   :  { %478 = vmatpush3.msra.mxu0 %v730_v7  ;;  %522 = vmatpush3.msra.mxu1 %v730_v7  ;;  %v849_v24 = vld [vmem:[%s1099_s4 + $0x98] sm:$0xff]  ;;  %v863_v26 = vld [vmem:[%s1099_s4 + $0x90] sm:$0xff]  ;;  %v877_v28 = vld [vmem:[%s1099_s4 + $0x88] sm:$0xff] }
   0xa   :  { %479 = vmatprep.subr.mxu0 %v737_v8  ;;  %523 = vmatprep.subr.mxu1 %v737_v8  ;;  %v856_v25 = vld [vmem:[%s1099_s4 + $0x18] sm:$0xff]  ;;  %v870_v27 = vld [vmem:[%s1099_s4 + $0x10] sm:$0xff]  ;;  %v884_v29 = vld [vmem:[%s1099_s4 + $0x8] sm:$0xff] }
   0xb   :  { %480 = vmatpush3.msra.mxu0 %v744_v9  ;;  %524 = vmatpush3.msra.mxu1 %v744_v9  ;;  %v891_v30 = vld [vmem:[%s1099_s4 + $0x80] sm:$0xff]  ;;  %v57_v32 = vld [vmem:[%s1100_s0 + $0x8] sm:$0xff]  ;;  %v59_v36 = vld [vmem:[%s1100_s0 + $0x18] sm:$0xff] }
   0xc   :  { %481 = vmatprep.subr.mxu0 %v751_v10  ;;  %525 = vmatprep.subr.mxu1 %v751_v10  ;;  %v898_v31 = vld [vmem:[%s1099_s4] sm:$0xff]  ;;  %v160_v33 = vld [vmem:[%s1101_s1 + $0x8] sm:$0xff]  ;;  %v162_v37 = vld [vmem:[%s1101_s1 + $0x18] sm:$0xff] }
   0xd   :  { %482 = vmatpush3.msra.mxu0 %v758_v11  ;;  %526 = vmatpush3.msra.mxu1 %v758_v11  ;;  %v56_v34 = vld [vmem:[%s1100_s0] sm:$0xff]  ;;  %v58_v38 = vld [vmem:[%s1100_s0 + $0x10] sm:$0xff]  ;;  %v61_v40 = vld [vmem:[%s1100_s0 + $0x28] sm:$0xff] }
   0xe   :  { %483 = vmatprep.subr.mxu0 %v765_v12  ;;  %527 = vmatprep.subr.mxu1 %v765_v12  ;;  %v159_v35 = vld [vmem:[%s1101_s1] sm:$0xff]  ;;  %v161_v39 = vld [vmem:[%s1101_s1 + $0x10] sm:$0xff]  ;;  %v164_v41 = vld [vmem:[%s1101_s1 + $0x28] sm:$0xff] }
   0xf   :  { %484 = vmatpush3.msra.mxu0 %v772_v13  ;;  %528 = vmatpush3.msra.mxu1 %v772_v13  ;;  %v60_v42 = vld [vmem:[%s1100_s0 + $0x20] sm:$0xff]  ;;  %v63_v44 = vld [vmem:[%s1100_s0 + $0x38] sm:$0xff]  ;;  %v62_v46 = vld [vmem:[%s1100_s0 + $0x30] sm:$0xff] }
  0x10   :  { %485 = vmatprep.subr.mxu0 %v779_v14  ;;  %529 = vmatprep.subr.mxu1 %v779_v14  ;;  %v163_v43 = vld [vmem:[%s1101_s1 + $0x20] sm:$0xff]  ;;  %v166_v45 = vld [vmem:[%s1101_s1 + $0x38] sm:$0xff]  ;;  %v165_v47 = vld [vmem:[%s1101_s1 + $0x30] sm:$0xff] }
  0x11   :  { %486 = vmatpush3.msra.mxu0 %v786_v15  ;;  %530 = vmatpush3.msra.mxu1 %v786_v15  ;;  %v261_v48 = vld [vmem:[%s1102_s2 + $0x8] sm:$0xff]  ;;  %v260_v50 = vld [vmem:[%s1102_s2] sm:$0xff]  ;;  %v263_v52 = vld [vmem:[%s1102_s2 + $0x18] sm:$0xff] }
  0x12   :  { %487 = vmatprep.subr.mxu0 %v793_v16  ;;  %531 = vmatprep.subr.mxu1 %v793_v16  ;;  %v358_v49 = vld [vmem:[%s1103_s3 + $0x8] sm:$0xff]  ;;  %v357_v51 = vld [vmem:[%s1103_s3] sm:$0xff]  ;;  %v360_v53 = vld [vmem:[%s1103_s3 + $0x18] sm:$0xff] }
  0x13   :  { %488 = vmatpush3.msra.mxu0 %v800_v17  ;;  %532 = vmatpush3.msra.mxu1 %v800_v17  ;;  %v262_v54 = vld [vmem:[%s1102_s2 + $0x10] sm:$0xff]  ;;  %v265_v56 = vld [vmem:[%s1102_s2 + $0x28] sm:$0xff]  ;;  %v264_v58 = vld [vmem:[%s1102_s2 + $0x20] sm:$0xff] }
  0x14   :  { %489 = vmatprep.subr.mxu0 %v807_v18  ;;  %533 = vmatprep.subr.mxu1 %v807_v18  ;;  %v359_v55 = vld [vmem:[%s1103_s3 + $0x10] sm:$0xff]  ;;  %v362_v57 = vld [vmem:[%s1103_s3 + $0x28] sm:$0xff]  ;;  %v361_v59 = vld [vmem:[%s1103_s3 + $0x20] sm:$0xff] }
  0x15   :  { %490 = vmatpush3.msra.mxu0 %v814_v19  ;;  %534 = vmatpush3.msra.mxu1 %v814_v19  ;;  %v267_v60 = vld [vmem:[%s1102_s2 + $0x38] sm:$0xff]  ;;  %v266_v62 = vld [vmem:[%s1102_s2 + $0x30] sm:$0xff] }
  0x16   :  { %491 = vmatprep.subr.mxu0 %v821_v20  ;;  %535 = vmatprep.subr.mxu1 %v821_v20  ;;  %v364_v61 = vld [vmem:[%s1103_s3 + $0x38] sm:$0xff]  ;;  %v363_v63 = vld [vmem:[%s1103_s3 + $0x30] sm:$0xff] }
  0x17   :  { %492 = vmatpush3.msra.mxu0 %v828_v21  ;;  %536 = vmatpush3.msra.mxu1 %v828_v21 }
  0x18   :  { %493 = vmatprep.subr.mxu0 %v835_v22  ;;  %537 = vmatprep.subr.mxu1 %v835_v22 }
  0x19   :  { %494 = vmatpush3.msra.mxu0 %v842_v23  ;;  %538 = vmatpush3.msra.mxu1 %v842_v23 }
  0x1a   :  { %495 = vmatprep.subr.mxu0 %v849_v24  ;;  %539 = vmatprep.subr.mxu1 %v849_v24 }
  0x1b   :  { %496 = vmatpush3.msra.mxu0 %v856_v25  ;;  %540 = vmatpush3.msra.mxu1 %v856_v25 }
  0x1c   :  { %497 = vmatprep.subr.mxu0 %v863_v26  ;;  %541 = vmatprep.subr.mxu1 %v863_v26 }
  0x1d   :  { %498 = vmatpush3.msra.mxu0 %v870_v27  ;;  %542 = vmatpush3.msra.mxu1 %v870_v27 }
  0x1e   :  { %499 = vmatprep.subr.mxu0 %v877_v28  ;;  %543 = vmatprep.subr.mxu1 %v877_v28 }
  0x1f   :  { %500 = vmatpush3.msra.mxu0 %v884_v29  ;;  %544 = vmatpush3.msra.mxu1 %v884_v29 }
  0x20   :  { %501 = vmatprep.subr.mxu0 %v891_v30  ;;  %545 = vmatprep.subr.mxu1 %v891_v30 }
  0x21   :  { %502 = vmatpush3.msra.mxu0 %v898_v31  ;;  %134 = vmatprep.mubr.f32.mxu0 %v57_v32 }
  0x22   :  { %546 = vmatpush3.msra.mxu1 %v898_v31  ;;  %231 = vmatprep.mubr.f32.mxu1 %v160_v33 }
  0x23   :  { %135 = vmatmul.mubr.f32.vlgmr.msra.gmra.mxu0 %v56_v34  ;;  %232 = vmatmul.mubr.f32.vlgmr.msra.gmra.mxu1 %v159_v35 }
  0x24   :  { %559 = vmatprep.subr.mxu0 %v685_v0  ;;  %603 = vmatprep.subr.mxu1 %v685_v0 }
  0x25   :  { %560 = vmatpush3.msra.mxu0 %v690_v1  ;;  %604 = vmatpush3.msra.mxu1 %v690_v1 }
  0x26   :  { %561 = vmatprep.subr.mxu0 %v695_v2  ;;  %605 = vmatprep.subr.mxu1 %v695_v2 }
  0x27   :  { %562 = vmatpush3.msra.mxu0 %v702_v3  ;;  %606 = vmatpush3.msra.mxu1 %v702_v3 }
  0x28   :  { %563 = vmatprep.subr.mxu0 %v709_v4  ;;  %607 = vmatprep.subr.mxu1 %v709_v4 }
  0x29   :  { %564 = vmatpush3.msra.mxu0 %v716_v5  ;;  %608 = vmatpush3.msra.mxu1 %v716_v5 }
  0x2a   :  { %565 = vmatprep.subr.mxu0 %v723_v6  ;;  %609 = vmatprep.subr.mxu1 %v723_v6 }
  0x2b   :  { %566 = vmatpush3.msra.mxu0 %v730_v7  ;;  %610 = vmatpush3.msra.mxu1 %v730_v7 }
  0x2c   :  { %567 = vmatprep.subr.mxu0 %v737_v8  ;;  %611 = vmatprep.subr.mxu1 %v737_v8 }
  0x2d   :  { %568 = vmatpush3.msra.mxu0 %v744_v9  ;;  %612 = vmatpush3.msra.mxu1 %v744_v9 }
  0x2e   :  { %569 = vmatprep.subr.mxu0 %v751_v10  ;;  %613 = vmatprep.subr.mxu1 %v751_v10 }
  0x2f   :  { %570 = vmatpush3.msra.mxu0 %v758_v11  ;;  %614 = vmatpush3.msra.mxu1 %v758_v11 }
  0x30   :  { %571 = vmatprep.subr.mxu0 %v765_v12  ;;  %615 = vmatprep.subr.mxu1 %v765_v12 }
  0x31   :  { %572 = vmatpush3.msra.mxu0 %v772_v13  ;;  %616 = vmatpush3.msra.mxu1 %v772_v13 }
  0x32   :  { %573 = vmatprep.subr.mxu0 %v779_v14  ;;  %617 = vmatprep.subr.mxu1 %v779_v14 }
  0x33   :  { %574 = vmatpush3.msra.mxu0 %v786_v15  ;;  %618 = vmatpush3.msra.mxu1 %v786_v15 }
  0x34   :  { %575 = vmatprep.subr.mxu0 %v793_v16  ;;  %619 = vmatprep.subr.mxu1 %v793_v16  ;;  %v1069_v16 = vld [vmem:[%s1104_s5] ss:$0 sm:$0xff] }
  0x35   :  { %139 = vmatprep.mubr.f32.mxu0 %v59_v36  ;;  %236 = vmatprep.mubr.f32.mxu1 %v162_v37 }
  0x36   :  { %576 = vmatpush3.msra.mxu0 %v800_v17  ;;  %620 = vmatpush3.msra.mxu1 %v800_v17 }
  0x37   :  { %140 = vmatmul.mubr.f32.gmra.mxu0 %v58_v38  ;;  %237 = vmatmul.mubr.f32.gmra.mxu1 %v161_v39 }
  0x38   :  { %577 = vmatprep.subr.mxu0 %v807_v18  ;;  %621 = vmatprep.subr.mxu1 %v807_v18 }
  0x39   :  { %578 = vmatpush3.msra.mxu0 %v814_v19  ;;  %622 = vmatpush3.msra.mxu1 %v814_v19 }
  0x3a   :  { %579 = vmatprep.subr.mxu0 %v821_v20  ;;  %623 = vmatprep.subr.mxu1 %v821_v20 }
  0x3b   :  { %144 = vmatprep.mubr.f32.mxu0 %v61_v40  ;;  %241 = vmatprep.mubr.f32.mxu1 %v164_v41 }
  0x3c   :  { %580 = vmatpush3.msra.mxu0 %v828_v21  ;;  %624 = vmatpush3.msra.mxu1 %v828_v21 }
  0x3d   :  { %145 = vmatmul.mubr.f32.gmra.mxu0 %v60_v42  ;;  %242 = vmatmul.mubr.f32.gmra.mxu1 %v163_v43 }
  0x3e   :  { %581 = vmatprep.subr.mxu0 %v835_v22  ;;  %625 = vmatprep.subr.mxu1 %v835_v22 }
  0x3f   :  { %582 = vmatpush3.msra.mxu0 %v842_v23  ;;  %626 = vmatpush3.msra.mxu1 %v842_v23 }
  0x40   :  { %583 = vmatprep.subr.mxu0 %v849_v24  ;;  %627 = vmatprep.subr.mxu1 %v849_v24 }
  0x41   :  { %149 = vmatprep.mubr.f32.mxu0 %v63_v44  ;;  %246 = vmatprep.mubr.f32.mxu1 %v166_v45 }
  0x42   :  { %584 = vmatpush3.msra.mxu0 %v856_v25  ;;  %628 = vmatpush3.msra.mxu1 %v856_v25 }
  0x43   :  { %150 = vmatmul.mubr.f32.gmra.mxu0 %v62_v46  ;;  %247 = vmatmul.mubr.f32.gmra.mxu1 %v165_v47 }
  0x44   :  { %585 = vmatprep.subr.mxu0 %v863_v26  ;;  %629 = vmatprep.subr.mxu1 %v863_v26 }
  0x45   :  { %586 = vmatpush3.msra.mxu0 %v870_v27  ;;  %630 = vmatpush3.msra.mxu1 %v870_v27 }
  0x46   :  { %587 = vmatprep.subr.mxu0 %v877_v28  ;;  %631 = vmatprep.subr.mxu1 %v877_v28 }
  0x47   :  { %588 = vmatpush3.msra.mxu0 %v884_v29  ;;  %632 = vmatpush3.msra.mxu1 %v884_v29 }
  0x48   :  { %589 = vmatprep.subr.mxu0 %v891_v30  ;;  %633 = vmatprep.subr.mxu1 %v891_v30 }
  0x49   :  { %590 = vmatpush3.msra.mxu0 %v898_v31  ;;  %332 = vmatprep.mubr.f32.mxu0 %v261_v48 }
  0x4a   :  { %634 = vmatpush3.msra.mxu1 %v898_v31  ;;  %429 = vmatprep.mubr.f32.mxu1 %v358_v49 }
  0x4b   :  { %333 = vmatmul.mubr.f32.vlgmr.msra.gmra.mxu0 %v260_v50  ;;  %430 = vmatmul.mubr.f32.vlgmr.msra.gmra.mxu1 %v357_v51 }
  0x4c   :  { %337 = vmatprep.mubr.f32.mxu0 %v263_v52  ;;  %434 = vmatprep.mubr.f32.mxu1 %v360_v53 }
  0x4f   :  { %338 = vmatmul.mubr.f32.gmra.mxu0 %v262_v54  ;;  %435 = vmatmul.mubr.f32.gmra.mxu1 %v359_v55 }
  0x50   :  { %342 = vmatprep.mubr.f32.mxu0 %v265_v56  ;;  %439 = vmatprep.mubr.f32.mxu1 %v362_v57 }
  0x53   :  { %343 = vmatmul.mubr.f32.gmra.mxu0 %v264_v58  ;;  %440 = vmatmul.mubr.f32.gmra.mxu1 %v361_v59 }
  0x54   :  { %347 = vmatprep.mubr.f32.mxu0 %v267_v60  ;;  %444 = vmatprep.mubr.f32.mxu1 %v364_v61 }
  0x57   :  { %348 = vmatmul.mubr.f32.gmra.mxu0 %v266_v62  ;;  %445 = vmatmul.mubr.f32.gmra.mxu1 %v363_v63 }
  0xe3   :  { %v503_v0 = vpop.f32.mrf.mxu0  ;;  %v547_v1 = vpop.f32.mrf.mxu1 }
  0xe5   :  { %v504_v2 = vpop.f32.mrf.mxu0  ;;  %v548_v3 = vpop.f32.mrf.mxu1 }
  0xe6   :  { %v505_v14 = vadd.f32 %v504_v2, %v503_v0  ;;  %v549_v15 = vadd.f32 %v548_v3, %v547_v1 }
  0xe8   :  { %v137_v19 = vadd.f32 %v505_v14, %v1069_v16  ;;  %v234_v20 = vadd.f32 %v549_v15, %v1069_v16 }
  0xea   :  { %v155_v29 = vmax.f32 %v137_v19, 0.0  ;;  %v252_v30 = vmax.f32 %v234_v20, 0.0 }
  0xec   :  { %v256_v45 = vmax.f32 %v155_v29, %v252_v30 }
  0xf7   :  { %v506_v4 = vpop.f32.mrf.mxu0  ;;  %v550_v5 = vpop.f32.mrf.mxu1 }
  0xf9   :  { %v507_v6 = vpop.f32.mrf.mxu0  ;;  %v551_v7 = vpop.f32.mrf.mxu1 }
  0xfa   :  { %v508_v21 = vadd.f32 %v507_v6, %v506_v4  ;;  %v552_v22 = vadd.f32 %v551_v7, %v550_v5 }
  0xfc   :  { %v142_v31 = vadd.f32 %v508_v21, %v1069_v16  ;;  %v239_v32 = vadd.f32 %v552_v22, %v1069_v16 }
  0xfd   :  { %v509_v8 = vpop.f32.mrf.mxu0  ;;  %v553_v9 = vpop.f32.mrf.mxu1 }
  0xfe   :  { %v156_v46 = vmax.f32 %v142_v31, 0.0  ;;  %v253_v47 = vmax.f32 %v239_v32, 0.0 }
  0xff   :  { %v510_v10 = vpop.f32.mrf.mxu0  ;;  %v554_v11 = vpop.f32.mrf.mxu1 }
 0x100   :  { %v511_v37 = vadd.f32 %v510_v10, %v509_v8  ;;  %v555_v38 = vadd.f32 %v554_v11, %v553_v9  ;;  %v257_v63 = vmax.f32 %v156_v46, %v253_v47 }
 0x102   :  { %v147_v55 = vadd.f32 %v511_v37, %v1069_v16  ;;  %v244_v56 = vadd.f32 %v555_v38, %v1069_v16 }
 0x103   :  { %v512_v12 = vpop.f32.mrf.mxu0  ;;  %v556_v13 = vpop.f32.mrf.mxu1 }
 0x104   :  { %v157_v7 = vmax.f32 %v147_v55, 0.0  ;;  %v254_v8 = vmax.f32 %v244_v56, 0.0 }
 0x105   :  { %v513_v17 = vpop.f32.mrf.mxu0  ;;  %v557_v18 = vpop.f32.mrf.mxu1 }
 0x106   :  { %v514_v48 = vadd.f32 %v513_v17, %v512_v12  ;;  %v558_v51 = vadd.f32 %v557_v18, %v556_v13  ;;  %v258_v22 = vmax.f32 %v157_v7, %v254_v8 }
 0x108   :  { %v152_v3 = vadd.f32 %v514_v48, %v1069_v16  ;;  %v249_v4 = vadd.f32 %v558_v51, %v1069_v16 }
 0x10a   :  { %v158_v18 = vmax.f32 %v152_v3, 0.0  ;;  %v255_v19 = vmax.f32 %v249_v4, 0.0 }
 0x10b   :  { %v591_v23 = vpop.f32.mrf.mxu0  ;;  %v635_v24 = vpop.f32.mrf.mxu1 }
 0x10d   :  { %v592_v25 = vpop.f32.mrf.mxu0  ;;  %v636_v26 = vpop.f32.mrf.mxu1 }
 0x10e   :  { %v593_v27 = vadd.f32 %v592_v25, %v591_v23  ;;  %v637_v28 = vadd.f32 %v636_v26, %v635_v24 }
 0x10f   :  { %v594_v33 = vpop.f32.mrf.mxu0  ;;  %v638_v34 = vpop.f32.mrf.mxu1 }
 0x110   :  { %v335_v35 = vadd.f32 %v593_v27, %v1069_v16  ;;  %v432_v36 = vadd.f32 %v637_v28, %v1069_v16  ;;  %v259_v27 = vmax.f32 %v158_v18, %v255_v19 }
 0x111   :  { %v595_v39 = vpop.f32.mrf.mxu0  ;;  %v639_v40 = vpop.f32.mrf.mxu1 }
 0x112   :  { %v353_v41 = vmax.f32 %v335_v35, 0.0  ;;  %v450_v42 = vmax.f32 %v432_v36, 0.0  ;;  %v596_v43 = vadd.f32 %v595_v39, %v594_v33  ;;  %v640_v44 = vadd.f32 %v639_v40, %v638_v34 }
 0x113   :  { %v597_v49 = vpop.f32.mrf.mxu0  ;;  %v641_v50 = vpop.f32.mrf.mxu1 }
 0x114   :  { %v454_v52 = vmax.f32 %v353_v41, %v450_v42  ;;  %v340_v53 = vadd.f32 %v596_v43, %v1069_v16  ;;  %v437_v54 = vadd.f32 %v640_v44, %v1069_v16 }
 0x115   :  { %v598_v57 = vpop.f32.mrf.mxu0  ;;  %v642_v58 = vpop.f32.mrf.mxu1 }
 0x116   :  { %v458_v59 = vmax.f32 %v256_v45, %v454_v52  ;;  %v354_v60 = vmax.f32 %v340_v53, 0.0  ;;  %v451_v61 = vmax.f32 %v437_v54, 0.0  ;;  %v599_v62 = vadd.f32 %v598_v57, %v597_v49 }
 0x117   :  { %v643_v0 = vadd.f32 %v642_v58, %v641_v50  ;;  %v600_v1 = vpop.f32.mrf.mxu0  ;;  %v644_v2 = vpop.f32.mrf.mxu1 }
 0x118   :  { %462 = vst [vmem:[%s1105_s6] sm:$0xff] %v458_v59  ;;  %v455_v5 = vmax.f32 %v354_v60, %v451_v61  ;;  %v345_v6 = vadd.f32 %v599_v62, %v1069_v16 }
 0x119   :  { %v442_v9 = vadd.f32 %v643_v0, %v1069_v16  ;;  %v601_v10 = vpop.f32.mrf.mxu0  ;;  %v645_v11 = vpop.f32.mrf.mxu1 }
 0x11a   :  { %v459_v12 = vmax.f32 %v257_v63, %v455_v5  ;;  %v355_v13 = vmax.f32 %v345_v6, 0.0  ;;  %v602_v14 = vadd.f32 %v601_v10, %v600_v1  ;;  %v646_v15 = vadd.f32 %v645_v11, %v644_v2 }
 0x11b   :  { %v452_v17 = vmax.f32 %v442_v9, 0.0 }
 0x11c   :  { %463 = vst [vmem:[%s1105_s6 + $0x8] sm:$0xff] %v459_v12  ;;  %v350_v20 = vadd.f32 %v602_v14, %v1069_v16  ;;  %v447_v21 = vadd.f32 %v646_v15, %v1069_v16 }
 0x11d   :  { %v456_v23 = vmax.f32 %v355_v13, %v452_v17 }
 0x11e   :  { %v356_v24 = vmax.f32 %v350_v20, 0.0  ;;  %v453_v25 = vmax.f32 %v447_v21, 0.0 }
 0x11f   :  { %v460_v26 = vmax.f32 %v258_v22, %v456_v23 }
 0x120   :  { %v457_v28 = vmax.f32 %v356_v24, %v453_v25 }
 0x121   :  { %464 = vst [vmem:[%s1105_s6 + $0x10] sm:$0xff] %v460_v26 }
 0x122   :  { %v461_v29 = vmax.f32 %v259_v27, %v457_v28 }
 0x124   :  { %465 = vst [vmem:[%s1105_s6 + $0x18] sm:$0xff] %v461_v29 }

// kernel: _lambda_.5
= control target key start
LH: loop header
LB: loop body
LE: loop exit
PB: predicated region body
PF: predicated region fallthrough
CT: control target
= control target key end

     0   :  { %v571_v3 = vmov 0.0   ;;  %vm121_vm0 = vcmask 523264   ;;  %s1161_s1 = inlined_call_operand.vmem [shape: f32[320,256], index: 1, kind: input, shape index: {}]   ;;  %s1162_s0 = inlined_call_operand.vmem [shape: f32[8,320], index: 0, kind: input, shape index: {}]   ;;  %s1163_s3 = inlined_call_operand.vmem [shape: f32[256,256], index: 3, kind: input, shape index: {}]   ;;  %s1164_s5 = inlined_call_operand.vmem [shape: f32[256,128], index: 5, kind: input, shape index: {}]   ;;  %s1165_s2 = inlined_call_operand.vmem [shape: f32[1,256], index: 2, kind: input, shape index: {}]   ;;  %s1166_s4 = inlined_call_operand.vmem [shape: f32[1,256], index: 4, kind: input, shape index: {}]   ;;  %s1167_s6 = inlined_call_operand.vmem [shape: f32[1,128], index: 6, kind: input, shape index: {}]   ;;  %s1168_s7 = inlined_call_operand.vmem [shape: f32[8,128], index: 7, kind: output, shape index: {}]  }
   0x1   :  { %v60_v0 = vld [vmem:[%s1161_s1 + $0xf8] sm:$0xff]  ;;  %v59_v1 = vld [vmem:[%s1161_s1 + $0xf0] sm:$0xff]  ;;  %v58_v2 = vld [vmem:[%s1161_s1 + $0xe8] sm:$0xff]  ;;  %260 = vmatprep.mubr.f32.mxu1 %v571_v3 }
   0x2   :  { %125 = vmatprep.subr.mxu0 %v60_v0  ;;  %v57_v4 = vld [vmem:[%s1161_s1 + $0xe0] sm:$0xff]  ;;  %v56_v5 = vld [vmem:[%s1161_s1 + $0xd8] sm:$0xff]  ;;  %v55_v6 = vld [vmem:[%s1161_s1 + $0xd0] sm:$0xff] }
   0x3   :  { %126 = vmatpush1.msra.mxu0 %v59_v1  ;;  %v54_v7 = vld [vmem:[%s1161_s1 + $0xc8] sm:$0xff]  ;;  %v53_v8 = vld [vmem:[%s1161_s1 + $0xc0] sm:$0xff]  ;;  %v52_v9 = vld [vmem:[%s1161_s1 + $0xb8] sm:$0xff] }
   0x4   :  { %127 = vmatprep.subr.mxu0 %v58_v2  ;;  %v51_v10 = vld [vmem:[%s1161_s1 + $0xb0] sm:$0xff]  ;;  %v50_v11 = vld [vmem:[%s1161_s1 + $0xa8] sm:$0xff]  ;;  %v49_v12 = vld [vmem:[%s1161_s1 + $0xa0] sm:$0xff] }
   0x5   :  { %128 = vmatpush1.msra.mxu0 %v57_v4  ;;  %v48_v13 = vld [vmem:[%s1161_s1 + $0x98] sm:$0xff]  ;;  %v47_v14 = vld [vmem:[%s1161_s1 + $0x90] sm:$0xff]  ;;  %v46_v15 = vld [vmem:[%s1161_s1 + $0x88] sm:$0xff] }
   0x6   :  { %129 = vmatprep.subr.mxu0 %v56_v5  ;;  %v45_v16 = vld [vmem:[%s1161_s1 + $0x80] sm:$0xff]  ;;  %v44_v17 = vld [vmem:[%s1161_s1 + $0x78] sm:$0xff]  ;;  %v43_v18 = vld [vmem:[%s1161_s1 + $0x70] sm:$0xff] }
   0x7   :  { %130 = vmatpush1.msra.mxu0 %v55_v6  ;;  %v42_v19 = vld [vmem:[%s1161_s1 + $0x68] sm:$0xff]  ;;  %v108_v20 = vld [vmem:[%s1161_s1 + $0x278] sm:$0xff]  ;;  %v41_v21 = vld [vmem:[%s1161_s1 + $0x60] sm:$0xff] }
   0x8   :  { %131 = vmatprep.subr.mxu0 %v54_v7  ;;  %212 = vmatprep.subr.mxu1 %v108_v20  ;;  %v107_v22 = vld [vmem:[%s1161_s1 + $0x270] sm:$0xff]  ;;  %v106_v23 = vld [vmem:[%s1161_s1 + $0x268] sm:$0xff]  ;;  %v40_v24 = vld [vmem:[%s1161_s1 + $0x58] sm:$0xff] }
   0x9   :  { %132 = vmatpush1.msra.mxu0 %v53_v8  ;;  %213 = vmatpush1.msra.mxu1 %v107_v22  ;;  %v105_v25 = vld [vmem:[%s1161_s1 + $0x260] sm:$0xff]  ;;  %v39_v26 = vld [vmem:[%s1161_s1 + $0x50] sm:$0xff]  ;;  %v104_v27 = vld [vmem:[%s1161_s1 + $0x258] sm:$0xff] }
   0xa   :  { %133 = vmatprep.subr.mxu0 %v52_v9  ;;  %214 = vmatprep.subr.mxu1 %v106_v23  ;;  %v103_v28 = vld [vmem:[%s1161_s1 + $0x250] sm:$0xff]  ;;  %v38_v29 = vld [vmem:[%s1161_s1 + $0x48] sm:$0xff]  ;;  %v37_v31 = vld [vmem:[%s1161_s1 + $0x40] sm:$0xff] }
   0xb   :  { %134 = vmatpush1.msra.mxu0 %v51_v10  ;;  %215 = vmatpush1.msra.mxu1 %v105_v25  ;;  %v102_v30 = vld [vmem:[%s1161_s1 + $0x248] sm:$0xff]  ;;  %v101_v32 = vld [vmem:[%s1161_s1 + $0x240] sm:$0xff]  ;;  %v36_v33 = vld [vmem:[%s1161_s1 + $0x38] sm:$0xff] }
   0xc   :  { %135 = vmatprep.subr.mxu0 %v50_v11  ;;  %216 = vmatprep.subr.mxu1 %v104_v27  ;;  %v100_v34 = vld [vmem:[%s1161_s1 + $0x238] sm:$0xff]  ;;  %v35_v35 = vld [vmem:[%s1161_s1 + $0x30] sm:$0xff]  ;;  %v34_v37 = vld [vmem:[%s1161_s1 + $0x28] sm:$0xff] }
   0xd   :  { %136 = vmatpush1.msra.mxu0 %v49_v12  ;;  %217 = vmatpush1.msra.mxu1 %v103_v28  ;;  %v99_v36 = vld [vmem:[%s1161_s1 + $0x230] sm:$0xff]  ;;  %v98_v38 = vld [vmem:[%s1161_s1 + $0x228] sm:$0xff]  ;;  %v33_v39 = vld [vmem:[%s1161_s1 + $0x20] sm:$0xff] }
   0xe   :  { %137 = vmatprep.subr.mxu0 %v48_v13  ;;  %218 = vmatprep.subr.mxu1 %v102_v30  ;;  %v97_v40 = vld [vmem:[%s1161_s1 + $0x220] sm:$0xff]  ;;  %v32_v41 = vld [vmem:[%s1161_s1 + $0x18] sm:$0xff]  ;;  %v31_v43 = vld [vmem:[%s1161_s1 + $0x10] sm:$0xff] }
   0xf   :  { %138 = vmatpush1.msra.mxu0 %v47_v14  ;;  %219 = vmatpush1.msra.mxu1 %v101_v32  ;;  %v96_v42 = vld [vmem:[%s1161_s1 + $0x218] sm:$0xff]  ;;  %v95_v44 = vld [vmem:[%s1161_s1 + $0x210] sm:$0xff]  ;;  %v30_v45 = vld [vmem:[%s1161_s1 + $0x8] sm:$0xff] }
  0x10   :  { %139 = vmatprep.subr.mxu0 %v46_v15  ;;  %220 = vmatprep.subr.mxu1 %v100_v34  ;;  %v94_v46 = vld [vmem:[%s1161_s1 + $0x208] sm:$0xff]  ;;  %v29_v47 = vld [vmem:[%s1161_s1] sm:$0xff]  ;;  %v92_v49 = vld [vmem:[%s1161_s1 + $0x1f8] sm:$0xff] }
  0x11   :  { %140 = vmatpush1.msra.mxu0 %v45_v16  ;;  %221 = vmatpush1.msra.mxu1 %v99_v36  ;;  %v27_v48 = vld [vmem:[%s1162_s0 + $0x8] sm:$0xff]  ;;  %v93_v50 = vld [vmem:[%s1161_s1 + $0x200] sm:$0xff]  ;;  %v91_v51 = vld [vmem:[%s1161_s1 + $0x1f0] sm:$0xff] }
  0x12   :  { %141 = vmatprep.subr.mxu0 %v44_v17  ;;  %222 = vmatprep.subr.mxu1 %v98_v38  ;;  %v28_v52 = vld [vmem:[%s1162_s0 + $0x10] sm:$0xff]  ;;  %v90_v53 = vld [vmem:[%s1161_s1 + $0x1e8] sm:$0xff]  ;;  %v300_v54 = vld [vmem:[%s1163_s3 + $0xf8] sm:$0xff] }
  0x13   :  { %142 = vmatpush1.msra.mxu0 %v43_v18  ;;  %223 = vmatpush1.msra.mxu1 %v97_v40  ;;  %v89_v55 = vld [vmem:[%s1161_s1 + $0x1e0] sm:$0xff]  ;;  %v299_v56 = vld [vmem:[%s1163_s3 + $0xf0] sm:$0xff]  ;;  %v88_v57 = vld [vmem:[%s1161_s1 + $0x1d8] sm:$0xff] }
  0x14   :  { %143 = vmatprep.subr.mxu0 %v42_v19  ;;  %224 = vmatprep.subr.mxu1 %v96_v42  ;;  %v298_v58 = vld [vmem:[%s1163_s3 + $0xe8] sm:$0xff]  ;;  %v87_v59 = vld [vmem:[%s1161_s1 + $0x1d0] sm:$0xff]  ;;  %v297_v60 = vld [vmem:[%s1163_s3 + $0xe0] sm:$0xff] }
  0x15   :  { %144 = vmatpush1.msra.mxu0 %v41_v21  ;;  %225 = vmatpush1.msra.mxu1 %v95_v44  ;;  %v86_v61 = vld [vmem:[%s1161_s1 + $0x1c8] sm:$0xff]  ;;  %v296_v62 = vld [vmem:[%s1163_s3 + $0xd8] sm:$0xff]  ;;  %v85_v63 = vld [vmem:[%s1161_s1 + $0x1c0] sm:$0xff] }
  0x16   :  { %145 = vmatprep.subr.mxu0 %v40_v24  ;;  %226 = vmatprep.subr.mxu1 %v94_v46  ;;  %v295_v0 = vld [vmem:[%s1163_s3 + $0xd0] sm:$0xff]  ;;  %v84_v1 = vld [vmem:[%s1161_s1 + $0x1b8] sm:$0xff]  ;;  %v294_v2 = vld [vmem:[%s1163_s3 + $0xc8] sm:$0xff] }
  0x17   :  { %146 = vmatpush1.msra.mxu0 %v39_v26  ;;  %189 = vmatprep.mubr.f32.mxu0 %v27_v48  ;;  %v83_v3 = vld [vmem:[%s1161_s1 + $0x1b0] sm:$0xff]  ;;  %v293_v4 = vld [vmem:[%s1163_s3 + $0xc0] sm:$0xff]  ;;  %v82_v5 = vld [vmem:[%s1161_s1 + $0x1a8] sm:$0xff] }
  0x18   :  { %147 = vmatprep.subr.mxu0 %v38_v29  ;;  %227 = vmatpush1.msra.mxu1 %v93_v50  ;;  %v292_v6 = vld [vmem:[%s1163_s3 + $0xb8] sm:$0xff]  ;;  %v81_v7 = vld [vmem:[%s1161_s1 + $0x1a0] sm:$0xff]  ;;  %v291_v8 = vld [vmem:[%s1163_s3 + $0xb0] sm:$0xff] }
  0x19   :  { %148 = vmatpush1.msra.mxu0 %v37_v31  ;;  %533 = vmatmul.mubr.msk.f32.vlgmr.msra.gmra.mxu1 %vm121_vm0, %v28_v52  ;;  %v80_v9 = vld [vmem:[%s1161_s1 + $0x198] sm:$0xff]  ;;  %v290_v10 = vld [vmem:[%s1163_s3 + $0xa8] sm:$0xff]  ;;  %v79_v11 = vld [vmem:[%s1161_s1 + $0x190] sm:$0xff] }
  0x1a   :  { %149 = vmatprep.subr.mxu0 %v36_v33  ;;  %345 = vmatprep.subr.mxu1 %v300_v54  ;;  %v289_v12 = vld [vmem:[%s1163_s3 + $0xa0] sm:$0xff]  ;;  %v78_v13 = vld [vmem:[%s1161_s1 + $0x188] sm:$0xff]  ;;  %v288_v14 = vld [vmem:[%s1163_s3 + $0x98] sm:$0xff] }
  0x1b   :  { %150 = vmatpush1.msra.mxu0 %v35_v35  ;;  %346 = vmatpush1.msra.mxu1 %v299_v56  ;;  %v77_v15 = vld [vmem:[%s1161_s1 + $0x180] sm:$0xff]  ;;  %v287_v16 = vld [vmem:[%s1163_s3 + $0x90] sm:$0xff]  ;;  %v76_v17 = vld [vmem:[%s1161_s1 + $0x178] sm:$0xff] }
  0x1c   :  { %151 = vmatprep.subr.mxu0 %v34_v37  ;;  %347 = vmatprep.subr.mxu1 %v298_v58  ;;  %v286_v18 = vld [vmem:[%s1163_s3 + $0x88] sm:$0xff]  ;;  %v75_v19 = vld [vmem:[%s1161_s1 + $0x170] sm:$0xff]  ;;  %v285_v20 = vld [vmem:[%s1163_s3 + $0x80] sm:$0xff] }
  0x1d   :  { %152 = vmatpush1.msra.mxu0 %v33_v39  ;;  %348 = vmatpush1.msra.mxu1 %v297_v60  ;;  %v74_v21 = vld [vmem:[%s1161_s1 + $0x168] sm:$0xff]  ;;  %v284_v22 = vld [vmem:[%s1163_s3 + $0x78] sm:$0xff]  ;;  %v73_v23 = vld [vmem:[%s1161_s1 + $0x160] sm:$0xff] }
  0x1e   :  { %153 = vmatprep.subr.mxu0 %v32_v41  ;;  %349 = vmatprep.subr.mxu1 %v296_v62  ;;  %v283_v24 = vld [vmem:[%s1163_s3 + $0x70] sm:$0xff]  ;;  %v72_v25 = vld [vmem:[%s1161_s1 + $0x158] sm:$0xff]  ;;  %v282_v26 = vld [vmem:[%s1163_s3 + $0x68] sm:$0xff] }
  0x1f   :  { %154 = vmatpush1.msra.mxu0 %v31_v43  ;;  %350 = vmatpush1.msra.mxu1 %v295_v0  ;;  %v71_v27 = vld [vmem:[%s1161_s1 + $0x150] sm:$0xff]  ;;  %v281_v28 = vld [vmem:[%s1163_s3 + $0x60] sm:$0xff]  ;;  %v70_v29 = vld [vmem:[%s1161_s1 + $0x148] sm:$0xff] }
  0x20   :  { %155 = vmatprep.subr.mxu0 %v30_v45  ;;  %351 = vmatprep.subr.mxu1 %v294_v2  ;;  %v280_v30 = vld [vmem:[%s1163_s3 + $0x58] sm:$0xff]  ;;  %v69_v31 = vld [vmem:[%s1161_s1 + $0x140] sm:$0xff]  ;;  %v279_v32 = vld [vmem:[%s1163_s3 + $0x50] sm:$0xff] }
  0x21   :  { %156 = vmatpush1.msra.mxu0 %v29_v47  ;;  %352 = vmatpush1.msra.mxu1 %v293_v4  ;;  %v68_v33 = vld [vmem:[%s1161_s1 + $0x138] sm:$0xff]  ;;  %v278_v34 = vld [vmem:[%s1163_s3 + $0x48] sm:$0xff]  ;;  %v67_v35 = vld [vmem:[%s1161_s1 + $0x130] sm:$0xff] }
  0x22   :  { %157 = vmatprep.subr.mxu0 %v92_v49  ;;  %353 = vmatprep.subr.mxu1 %v292_v6  ;;  %v277_v36 = vld [vmem:[%s1163_s3 + $0x40] sm:$0xff]  ;;  %v66_v37 = vld [vmem:[%s1161_s1 + $0x128] sm:$0xff]  ;;  %v276_v38 = vld [vmem:[%s1163_s3 + $0x38] sm:$0xff] }
  0x23   :  { %158 = vmatpush2.msra.mxu0 %v91_v51  ;;  %354 = vmatpush1.msra.mxu1 %v291_v8  ;;  %v65_v39 = vld [vmem:[%s1161_s1 + $0x120] sm:$0xff]  ;;  %v275_v40 = vld [vmem:[%s1163_s3 + $0x30] sm:$0xff]  ;;  %v64_v41 = vld [vmem:[%s1161_s1 + $0x118] sm:$0xff] }
  0x24   :  { %159 = vmatprep.subr.mxu0 %v90_v53  ;;  %355 = vmatprep.subr.mxu1 %v290_v10  ;;  %v274_v42 = vld [vmem:[%s1163_s3 + $0x28] sm:$0xff]  ;;  %v63_v43 = vld [vmem:[%s1161_s1 + $0x110] sm:$0xff]  ;;  %v273_v44 = vld [vmem:[%s1163_s3 + $0x20] sm:$0xff] }
  0x25   :  { %160 = vmatpush2.msra.mxu0 %v89_v55  ;;  %356 = vmatpush1.msra.mxu1 %v289_v12  ;;  %v62_v45 = vld [vmem:[%s1161_s1 + $0x108] sm:$0xff]  ;;  %v272_v46 = vld [vmem:[%s1163_s3 + $0x18] sm:$0xff]  ;;  %v61_v47 = vld [vmem:[%s1161_s1 + $0x100] sm:$0xff] }
  0x26   :  { %161 = vmatprep.subr.mxu0 %v88_v57  ;;  %357 = vmatprep.subr.mxu1 %v288_v14  ;;  %v271_v48 = vld [vmem:[%s1163_s3 + $0x10] sm:$0xff]  ;;  %v26_v49 = vld [vmem:[%s1162_s0] sm:$0xff]  ;;  %v270_v50 = vld [vmem:[%s1163_s3 + $0x8] sm:$0xff] }
  0x27   :  { %162 = vmatpush2.msra.mxu0 %v87_v59  ;;  %358 = vmatpush1.msra.mxu1 %v287_v16  ;;  %v269_v51 = vld [vmem:[%s1163_s3] sm:$0xff]  ;;  %v332_v52 = vld [vmem:[%s1163_s3 + $0x1f8] sm:$0xff]  ;;  %v331_v53 = vld [vmem:[%s1163_s3 + $0x1f0] sm:$0xff] }
  0x28   :  { %163 = vmatprep.subr.mxu0 %v86_v61  ;;  %359 = vmatprep.subr.mxu1 %v286_v18  ;;  %v330_v54 = vld [vmem:[%s1163_s3 + $0x1e8] sm:$0xff]  ;;  %v329_v55 = vld [vmem:[%s1163_s3 + $0x1e0] sm:$0xff]  ;;  %v328_v56 = vld [vmem:[%s1163_s3 + $0x1d8] sm:$0xff] }
  0x29   :  { %164 = vmatpush2.msra.mxu0 %v85_v63  ;;  %360 = vmatpush1.msra.mxu1 %v285_v20  ;;  %v327_v57 = vld [vmem:[%s1163_s3 + $0x1d0] sm:$0xff]  ;;  %v326_v58 = vld [vmem:[%s1163_s3 + $0x1c8] sm:$0xff]  ;;  %v325_v59 = vld [vmem:[%s1163_s3 + $0x1c0] sm:$0xff] }
  0x2a   :  { %165 = vmatprep.subr.mxu0 %v84_v1  ;;  %361 = vmatprep.subr.mxu1 %v284_v22  ;;  %v324_v60 = vld [vmem:[%s1163_s3 + $0x1b8] sm:$0xff]  ;;  %v323_v61 = vld [vmem:[%s1163_s3 + $0x1b0] sm:$0xff]  ;;  %v322_v62 = vld [vmem:[%s1163_s3 + $0x1a8] sm:$0xff] }
  0x2b   :  { %166 = vmatpush2.msra.mxu0 %v83_v3  ;;  %362 = vmatpush1.msra.mxu1 %v283_v24  ;;  %v321_v63 = vld [vmem:[%s1163_s3 + $0x1a0] sm:$0xff]  ;;  %v320_v0 = vld [vmem:[%s1163_s3 + $0x198] sm:$0xff]  ;;  %v319_v1 = vld [vmem:[%s1163_s3 + $0x190] sm:$0xff] }
  0x2c   :  { %167 = vmatprep.subr.mxu0 %v82_v5  ;;  %363 = vmatprep.subr.mxu1 %v282_v26  ;;  %v318_v2 = vld [vmem:[%s1163_s3 + $0x188] sm:$0xff]  ;;  %v317_v3 = vld [vmem:[%s1163_s3 + $0x180] sm:$0xff]  ;;  %v316_v4 = vld [vmem:[%s1163_s3 + $0x178] sm:$0xff] }
  0x2d   :  { %168 = vmatpush2.msra.mxu0 %v81_v7  ;;  %364 = vmatpush1.msra.mxu1 %v281_v28  ;;  %v315_v5 = vld [vmem:[%s1163_s3 + $0x170] sm:$0xff]  ;;  %v314_v6 = vld [vmem:[%s1163_s3 + $0x168] sm:$0xff]  ;;  %v313_v7 = vld [vmem:[%s1163_s3 + $0x160] sm:$0xff] }
  0x2e   :  { %169 = vmatprep.subr.mxu0 %v80_v9  ;;  %365 = vmatprep.subr.mxu1 %v280_v30  ;;  %v312_v8 = vld [vmem:[%s1163_s3 + $0x158] sm:$0xff]  ;;  %v311_v9 = vld [vmem:[%s1163_s3 + $0x150] sm:$0xff]  ;;  %v310_v10 = vld [vmem:[%s1163_s3 + $0x148] sm:$0xff] }
  0x2f   :  { %170 = vmatpush2.msra.mxu0 %v79_v11  ;;  %366 = vmatpush1.msra.mxu1 %v279_v32  ;;  %v309_v11 = vld [vmem:[%s1163_s3 + $0x140] sm:$0xff]  ;;  %v308_v12 = vld [vmem:[%s1163_s3 + $0x138] sm:$0xff]  ;;  %v306_v14 = vld [vmem:[%s1163_s3 + $0x128] sm:$0xff] }
  0x30   :  { %171 = vmatprep.subr.mxu0 %v78_v13  ;;  %367 = vmatprep.subr.mxu1 %v278_v34  ;;  %v307_v13 = vld [vmem:[%s1163_s3 + $0x130] sm:$0xff]  ;;  %v304_v16 = vld [vmem:[%s1163_s3 + $0x118] sm:$0xff]  ;;  %v302_v18 = vld [vmem:[%s1163_s3 + $0x108] sm:$0xff] }
  0x31   :  { %172 = vmatpush2.msra.mxu0 %v77_v15  ;;  %368 = vmatpush1.msra.mxu1 %v277_v36  ;;  %v305_v15 = vld [vmem:[%s1163_s3 + $0x120] sm:$0xff]  ;;  %v449_v20 = vld [vmem:[%s1164_s5 + $0xf8] sm:$0xff]  ;;  %v448_v22 = vld [vmem:[%s1164_s5 + $0xf0] sm:$0xff] }
  0x32   :  { %173 = vmatprep.subr.mxu0 %v76_v17  ;;  %369 = vmatprep.subr.mxu1 %v276_v38  ;;  %v303_v17 = vld [vmem:[%s1163_s3 + $0x110] sm:$0xff]  ;;  %v447_v24 = vld [vmem:[%s1164_s5 + $0xe8] sm:$0xff]  ;;  %v446_v26 = vld [vmem:[%s1164_s5 + $0xe0] sm:$0xff] }
  0x33   :  { %174 = vmatpush2.msra.mxu0 %v75_v19  ;;  %370 = vmatpush1.msra.mxu1 %v275_v40  ;;  %v301_v19 = vld [vmem:[%s1163_s3 + $0x100] sm:$0xff]  ;;  %v445_v28 = vld [vmem:[%s1164_s5 + $0xd8] sm:$0xff]  ;;  %v444_v30 = vld [vmem:[%s1164_s5 + $0xd0] sm:$0xff] }
  0x34   :  { %175 = vmatprep.subr.mxu0 %v74_v21  ;;  %371 = vmatprep.subr.mxu1 %v274_v42  ;;  %v433_v21 = vld [vmem:[%s1164_s5 + $0x78] sm:$0xff]  ;;  %v443_v32 = vld [vmem:[%s1164_s5 + $0xc8] sm:$0xff]  ;;  %v442_v34 = vld [vmem:[%s1164_s5 + $0xc0] sm:$0xff] }
  0x35   :  { %176 = vmatpush2.msra.mxu0 %v73_v23  ;;  %372 = vmatpush1.msra.mxu1 %v273_v44  ;;  %v432_v23 = vld [vmem:[%s1164_s5 + $0x70] sm:$0xff]  ;;  %v441_v36 = vld [vmem:[%s1164_s5 + $0xb8] sm:$0xff]  ;;  %v439_v40 = vld [vmem:[%s1164_s5 + $0xa8] sm:$0xff]  ;;  %v111_v44 = vlaneseq }
  0x36   :  { %177 = vmatprep.subr.mxu0 %v72_v25  ;;  %373 = vmatprep.subr.mxu1 %v272_v46  ;;  %v431_v25 = vld [vmem:[%s1164_s5 + $0x68] sm:$0xff]  ;;  %v440_v38 = vld [vmem:[%s1164_s5 + $0xb0] sm:$0xff]  ;;  %v438_v42 = vld [vmem:[%s1164_s5 + $0xa0] sm:$0xff] }
  0x37   :  { %178 = vmatpush2.msra.mxu0 %v71_v27  ;;  %374 = vmatpush1.msra.mxu1 %v271_v48  ;;  %v430_v27 = vld [vmem:[%s1164_s5 + $0x60] sm:$0xff] }
  0x38   :  { %179 = vmatprep.subr.mxu0 %v70_v29  ;;  %375 = vmatprep.subr.mxu1 %v270_v50  ;;  %v429_v29 = vld [vmem:[%s1164_s5 + $0x58] sm:$0xff] }
  0x39   :  { %180 = vmatpush2.msra.mxu0 %v69_v31  ;;  %376 = vmatpush1.msra.mxu1 %v269_v51  ;;  %v428_v31 = vld [vmem:[%s1164_s5 + $0x50] sm:$0xff] }
  0x3a   :  { %181 = vmatprep.subr.mxu0 %v68_v33  ;;  %377 = vmatprep.subr.mxu1 %v332_v52  ;;  %v427_v33 = vld [vmem:[%s1164_s5 + $0x48] sm:$0xff] }
  0x3b   :  { %182 = vmatpush2.msra.mxu0 %v67_v35  ;;  %378 = vmatpush2.msra.mxu1 %v331_v53  ;;  %v426_v35 = vld [vmem:[%s1164_s5 + $0x40] sm:$0xff] }
  0x3c   :  { %183 = vmatprep.subr.mxu0 %v66_v37  ;;  %379 = vmatprep.subr.mxu1 %v330_v54  ;;  %v425_v37 = vld [vmem:[%s1164_s5 + $0x38] sm:$0xff] }
  0x3d   :  { %184 = vmatpush2.msra.mxu0 %v65_v39  ;;  %380 = vmatpush2.msra.mxu1 %v329_v55  ;;  %v424_v39 = vld [vmem:[%s1164_s5 + $0x30] sm:$0xff] }
  0x3e   :  { %185 = vmatprep.subr.mxu0 %v64_v41  ;;  %381 = vmatprep.subr.mxu1 %v328_v56  ;;  %v423_v41 = vld [vmem:[%s1164_s5 + $0x28] sm:$0xff] }
  0x3f   :  { %186 = vmatpush2.msra.mxu0 %v63_v43  ;;  %382 = vmatpush2.msra.mxu1 %v327_v57  ;;  %v422_v43 = vld [vmem:[%s1164_s5 + $0x20] sm:$0xff] }
  0x40   :  { %187 = vmatprep.subr.mxu0 %v62_v45  ;;  %383 = vmatprep.subr.mxu1 %v326_v58  ;;  %v112_v45 = vshrl.u32 %v111_v44, 7 }
  0x41   :  { %188 = vmatpush2.msra.mxu0 %v61_v47  ;;  %384 = vmatpush2.msra.mxu1 %v325_v59  ;;  %v109_v47 = vld [vmem:[%s1165_s2] sm:$0x3] }
  0x42   :  { %190 = vmatmul.mubr.f32.vlgmr.msra.gmra.mxu0 %v26_v49  ;;  %385 = vmatprep.subr.mxu1 %v324_v60  ;;  %v113_v46 = vsub.s32 0, %v112_v45  ;;  %v117_v48 = vsub.s32 1, %v112_v45 }
  0x43   :  { %386 = vmatpush2.msra.mxu1 %v323_v61  ;;  %535 = vmatprep.subr.mxu0 %v449_v20  ;;  %v437_v61 = vld [vmem:[%s1164_s5 + $0x98] sm:$0xff] }
  0x44   :  { %387 = vmatprep.subr.mxu1 %v322_v62  ;;  %536 = vmatpush3.msra.mxu0 %v433_v21  ;;  %v114_v49 = vrot.slane %v109_v47, %v113_v46  ;;  %v118_v50 = vrot.slane %v109_v47, %v117_v48  ;;  %v421_v62 = vld [vmem:[%s1164_s5 + $0x18] sm:$0xff] }
  0x45   :  { %388 = vmatpush2.msra.mxu1 %v321_v63  ;;  %537 = vmatprep.subr.mxu0 %v448_v22  ;;  %v436_v63 = vld [vmem:[%s1164_s5 + $0x90] sm:$0xff] }
  0x46   :  { %389 = vmatprep.subr.mxu1 %v320_v0  ;;  %538 = vmatpush3.msra.mxu0 %v432_v23  ;;  %v420_v0 = vld [vmem:[%s1164_s5 + $0x10] sm:$0xff] }
  0x47   :  { %390 = vmatpush2.msra.mxu1 %v319_v1  ;;  %539 = vmatprep.subr.mxu0 %v447_v24  ;;  %v435_v1 = vld [vmem:[%s1164_s5 + $0x88] sm:$0xff] }
  0x48   :  { %391 = vmatprep.subr.mxu1 %v318_v2  ;;  %540 = vmatpush3.msra.mxu0 %v431_v25  ;;  %v419_v2 = vld [vmem:[%s1164_s5 + $0x8] sm:$0xff] }
  0x49   :  { %392 = vmatpush2.msra.mxu1 %v317_v3  ;;  %541 = vmatprep.subr.mxu0 %v446_v26  ;;  %v434_v3 = vld [vmem:[%s1164_s5 + $0x80] sm:$0xff] }
  0x4a   :  { %393 = vmatprep.subr.mxu1 %v316_v4  ;;  %542 = vmatpush3.msra.mxu0 %v430_v27  ;;  %v418_v4 = vld [vmem:[%s1164_s5] sm:$0xff] }
  0x4b   :  { %394 = vmatpush2.msra.mxu1 %v315_v5  ;;  %543 = vmatprep.subr.mxu0 %v445_v28  ;;  %v333_v5 = vld [vmem:[%s1166_s4] sm:$0x3] }
  0x4c   :  { %395 = vmatprep.subr.mxu1 %v314_v6  ;;  %544 = vmatpush3.msra.mxu0 %v429_v29  ;;  %v338_v6 = vrot.slane %v333_v5, %v113_v46 }
  0x4d   :  { %396 = vmatpush2.msra.mxu1 %v313_v7  ;;  %545 = vmatprep.subr.mxu0 %v444_v30  ;;  %v342_v7 = vrot.slane %v333_v5, %v117_v48 }
  0x4e   :  { %397 = vmatprep.subr.mxu1 %v312_v8  ;;  %546 = vmatpush3.msra.mxu0 %v428_v31 }
  0x4f   :  { %398 = vmatpush2.msra.mxu1 %v311_v9  ;;  %547 = vmatprep.subr.mxu0 %v443_v32 }
  0x50   :  { %399 = vmatprep.subr.mxu1 %v310_v10  ;;  %548 = vmatpush3.msra.mxu0 %v427_v33 }
  0x51   :  { %400 = vmatpush2.msra.mxu1 %v309_v11  ;;  %549 = vmatprep.subr.mxu0 %v442_v34 }
  0x52   :  { %401 = vmatprep.subr.mxu1 %v308_v12  ;;  %550 = vmatpush3.msra.mxu0 %v426_v35 }
  0x53   :  { %402 = vmatpush2.msra.mxu1 %v307_v13  ;;  %551 = vmatprep.subr.mxu0 %v441_v36 }
  0x54   :  { %403 = vmatprep.subr.mxu1 %v306_v14  ;;  %552 = vmatpush3.msra.mxu0 %v425_v37 }
  0x55   :  { %404 = vmatpush2.msra.mxu1 %v305_v15  ;;  %553 = vmatprep.subr.mxu0 %v440_v38  ;;  %v534_v15 = vld [vmem:[%s1167_s6] ss:$0 sm:$0xff] }
  0x56   :  { %405 = vmatprep.subr.mxu1 %v304_v16  ;;  %554 = vmatpush3.msra.mxu0 %v424_v39 }
  0x57   :  { %406 = vmatpush2.msra.mxu1 %v303_v17  ;;  %555 = vmatprep.subr.mxu0 %v439_v40 }
  0x58   :  { %407 = vmatprep.subr.mxu1 %v302_v18  ;;  %556 = vmatpush3.msra.mxu0 %v423_v41 }
  0x59   :  { %408 = vmatpush2.msra.mxu1 %v301_v19  ;;  %557 = vmatprep.subr.mxu0 %v438_v42 }
  0x5a   :  { %558 = vmatpush3.msra.mxu0 %v422_v43 }
  0x5b   :  { %559 = vmatprep.subr.mxu0 %v437_v61 }
  0x5c   :  { %560 = vmatpush3.msra.mxu0 %v421_v62 }
  0x5d   :  { %561 = vmatprep.subr.mxu0 %v436_v63 }
  0x5e   :  { %562 = vmatpush3.msra.mxu0 %v420_v0 }
  0x5f   :  { %563 = vmatprep.subr.mxu0 %v435_v1 }
  0x60   :  { %564 = vmatpush3.msra.mxu0 %v419_v2 }
  0x61   :  { %565 = vmatprep.subr.mxu0 %v434_v3 }
  0x62   :  { %566 = vmatpush3.msra.mxu0 %v418_v4 }
  0xd9   :  { %v262_v52 = vpop.f32.mrf.mxu1 }
  0xdb   :  { %v264_v57 = vpop.f32.mrf.mxu1 }
 0x102   :  { %v191_v51 = vpop.f32.mrf.mxu0 }
 0x103   :  { %v192_v53 = vadd.f32 %v191_v51, %v114_v49 }
 0x104   :  { %v193_v54 = vpop.f32.mrf.mxu0 }
 0x105   :  { %v194_v55 = vadd.f32 %v193_v54, %v118_v50  ;;  %v263_v56 = vadd.f32 %v262_v52, %v192_v53 }
 0x107   :  { %v265_v58 = vadd.f32 %v264_v57, %v194_v55  ;;  %v267_v60 = vmax.f32 %v263_v56, 0.0 }
 0x109   :  { %v268_v59 = vmax.f32 %v265_v58, 0.0 }
 0x10b   :  { %409 = vmatprep.mubr.f32.mxu1 %v268_v59 }
 0x10c   :  { %410 = vmatmul.mubr.f32.vlgmr.msra.gmra.mxu1 %v267_v60 }
 0x1cc   :  { %v411_v8 = vpop.f32.mrf.mxu1 }
 0x1cd   :  { %v412_v9 = vadd.f32 %v411_v8, %v338_v6 }
 0x1ce   :  { %v413_v10 = vpop.f32.mrf.mxu1 }
 0x1cf   :  { %v414_v11 = vadd.f32 %v413_v10, %v342_v7  ;;  %v416_v13 = vmax.f32 %v412_v9, 0.0 }
 0x1d1   :  { %v417_v12 = vmax.f32 %v414_v11, 0.0 }
 0x1d3   :  { %521 = vmatprep.mubr.f32.mxu0 %v417_v12 }
 0x1d4   :  { %522 = vmatmul.mubr.f32.vlgmr.msra.gmra.mxu0 %v416_v13 }
 0x294   :  { %v567_v14 = vpop.f32.mrf.mxu0 }
 0x296   :  { %v568_v16 = vpop.f32.mrf.mxu0 }
 0x297   :  { %v569_v17 = vadd.f32 %v568_v16, %v567_v14 }
 0x299   :  { %v524_v18 = vadd.f32 %v569_v17, %v534_v15 }
 0x29b   :  { %v527_v19 = vmax.f32 %v524_v18, 0.0 }
 0x29d   :  { %528 = vst [vmem:[%s1168_s7] sm:$0xff] %v527_v19 }

</bundles_post_ra>
